<compile_context>
chip_gen: v7x
topology: tpu7x:2x2x1
jax: 0.10.0
libtpu: 0.0.40
codegen_flags: <defaults>
</compile_context>

<pallas_src>
import functools
import math

import jax
import jax.numpy as jnp
from jax.experimental import pallas as pl
from jax.experimental.pallas import tpu as pltpu


# -----------------------------------------------------------------------------
# In-kernel helpers
# -----------------------------------------------------------------------------
def _layernorm(x, gamma, beta, eps=1e-5):
    mean = jnp.mean(x, axis=-1, keepdims=True)
    var = jnp.mean((x - mean) ** 2, axis=-1, keepdims=True)
    return (x - mean) * jax.lax.rsqrt(var + eps) * gamma + beta


# -----------------------------------------------------------------------------
# Fused kernel: one grid step == one nn.TransformerEncoderLayer (post-norm, ReLU)
# for one batch tile; the last layer step also applies the final LayerNorm +
# output Linear. Activation (TB*S, D) lives in a VMEM scratch across the layer axis.
# -----------------------------------------------------------------------------
def _lm_kernel(TB, S, H,
               x_ref, mask_ref,
               wqkv_ref, bqkv_ref, wo_ref, bo_ref,
               g1_ref, be1_ref, g2_ref, be2_ref,
               w1_ref, b1_ref, w2_ref, b2_ref,
               gf_ref, bf_ref, wout_ref, bout_ref,
               out_ref,
               x_scr):
    l = pl.program_id(1)
    nl = pl.num_programs(1)

    # Load the embedded tokens for this batch tile into the resident scratch once.
    @pl.when(l == 0)
    def _():
        x_scr[...] = x_ref[...]

    x = x_scr[...]                                  # (M, D) f32, M = TB*S
    M, D = x.shape
    Dh = D // H
    xb = x.astype(jnp.bfloat16)
    mask = mask_ref[...]                            # (S, S) additive causal mask, f32

    # --- fused QKV projection: one lane-dense (M, 3D) matmul -----------------------
    # 1/sqrt(Dh) is already folded into the Q slice of wqkv/bqkv at pack time.
    qkv = jnp.dot(xb, wqkv_ref[0], preferred_element_type=jnp.float32) + bqkv_ref[0]
    qkv = qkv.astype(jnp.bfloat16)                  # (M, 3D)

    # --- multi-head self attention --------------------------------------------------
    # Attention einsums are batched over the batch dim; the (small, static) head loop
    # only slices lanes of the already-computed qkv — all heavy matmuls are head-fused.
    ctx_heads = []
    for h in range(H):
        q_h = qkv[:, 0 * D + h * Dh:0 * D + (h + 1) * Dh].reshape(TB, S, Dh)
        k_h = qkv[:, 1 * D + h * Dh:1 * D + (h + 1) * Dh].reshape(TB, S, Dh)
        v_h = qkv[:, 2 * D + h * Dh:2 * D + (h + 1) * Dh].reshape(TB, S, Dh)

        s = jnp.einsum('bqd,bkd->bqk', q_h, k_h,
                       preferred_element_type=jnp.float32)       # (TB, S, S)
        s = s + mask                                              # additive causal mask
        m = jnp.max(s, axis=-1, keepdims=True)
        p = jnp.exp(s - m)
        p = p * pl.reciprocal(jnp.sum(p, axis=-1, keepdims=True), approx=True)

        ctx_heads.append(jnp.einsum('bqk,bkd->bqd', p.astype(jnp.bfloat16), v_h,
                                    preferred_element_type=jnp.float32))

    # (TB, S, D) with heads contiguous along the lane dim, as in PyTorch MHA.
    ctx = jnp.concatenate(ctx_heads, axis=-1).reshape(M, D).astype(jnp.bfloat16)

    # Single full-depth out-projection (K = D).
    attn = jnp.dot(ctx, wo_ref[0], preferred_element_type=jnp.float32) + bo_ref[0]

    # residual + norm1 (post-norm)
    x1 = _layernorm(x + attn, g1_ref[0], be1_ref[0])

    # --- feed-forward (ReLU); dropout is identity in eval mode ----------------------
    h1 = jnp.maximum(
        jnp.dot(x1.astype(jnp.bfloat16), w1_ref[0],
                preferred_element_type=jnp.float32) + b1_ref[0], 0.0)
    ff = jnp.dot(h1.astype(jnp.bfloat16), w2_ref[0],
                 preferred_element_type=jnp.float32) + b2_ref[0]

    # residual + norm2
    x2 = _layernorm(x1 + ff, g2_ref[0], be2_ref[0])
    x_scr[...] = x2

    # --- final LayerNorm + output projection (lane-dense padded vocab) --------------
    @pl.when(l == nl - 1)
    def _():
        xn = _layernorm(x2, gf_ref[...], bf_ref[...])
        out_ref[...] = (jnp.dot(xn.astype(jnp.bfloat16), wout_ref[...],
                                preferred_element_type=jnp.float32)
                        + bout_ref[...])


# -----------------------------------------------------------------------------
# pallas_call wrapper
# -----------------------------------------------------------------------------
def _fused_transformer(x, mask, kp, B, S, H, TB):
    M, D = x.shape
    L = kp["wqkv"].shape[0]
    F = kp["w1"].shape[2]
    Vp = kp["wout"].shape[1]
    Dh = D // H
    MT = TB * S                                     # rows per batch tile

    row = lambda b, l: (b, 0)                       # batch-tiled blocks
    lw3 = lambda b, l: (l, 0, 0)                    # per-layer stacked weights
    c2 = lambda b, l: (0, 0)                        # constant (shared) blocks

    in_specs = [
        pl.BlockSpec((MT, D), row),                 # x (embedded tokens)
        pl.BlockSpec((S, S), c2),                   # causal additive mask
        pl.BlockSpec((1, D, 3 * D), lw3),           # wqkv
        pl.BlockSpec((1, 1, 3 * D), lw3),           # bqkv
        pl.BlockSpec((1, D, D), lw3),               # wo
        pl.BlockSpec((1, 1, D), lw3),               # bo
        pl.BlockSpec((1, 1, D), lw3),               # norm1 gamma
        pl.BlockSpec((1, 1, D), lw3),               # norm1 beta
        pl.BlockSpec((1, 1, D), lw3),               # norm2 gamma
        pl.BlockSpec((1, 1, D), lw3),               # norm2 beta
        pl.BlockSpec((1, D, F), lw3),               # w1
        pl.BlockSpec((1, 1, F), lw3),               # b1
        pl.BlockSpec((1, F, D), lw3),               # w2
        pl.BlockSpec((1, 1, D), lw3),               # b2
        pl.BlockSpec((1, D), c2),                   # final norm gamma
        pl.BlockSpec((1, D), c2),                   # final norm beta
        pl.BlockSpec((D, Vp), c2),                  # output weight (pre-transposed, padded)
        pl.BlockSpec((1, Vp), c2),                  # output bias (padded)
    ]
    out_specs = pl.BlockSpec((MT, Vp), row)

    # Advisory cost estimate so XLA schedules the glue (embedding gather) around the kernel.
    flops_layer = (2 * M * D * (3 * D)              # fused qkv projection
                   + 2 * (2 * B * H * S * S * Dh)   # scores + context
                   + 2 * M * D * D                  # out projection
                   + 2 * (2 * M * D * F))           # feed-forward
    flops = L * flops_layer + 2 * M * D * Vp
    transcendentals = L * (B * H * S * S + 2 * M) + M
    weight_bytes = sum(int(v.size) * v.dtype.itemsize
                       for k, v in kp.items()
                       if k not in ("embedding", "pos_embedding"))
    bytes_accessed = (int(x.size) * 4 + M * Vp * 4
                      + weight_bytes * (B // TB))   # weights re-streamed per batch tile

    return pl.pallas_call(
        functools.partial(_lm_kernel, TB, S, H),
        out_shape=jax.ShapeDtypeStruct((M, Vp), jnp.float32),
        grid=(B // TB, L),
        in_specs=in_specs,
        out_specs=out_specs,
        scratch_shapes=[pltpu.VMEM((MT, D), jnp.float32)],
        compiler_params=pltpu.CompilerParams(
            # Batch-tile axis parallel (feeds both v7x TensorCores); layer axis sequential.
            dimension_semantics=("parallel", "arbitrary"),
            # Generation note: raise toward ~100 MiB on v5e/v6e at realistic sizes,
            # keep <= ~48-64 MiB on v7x (64 MiB physical VMEM).
            vmem_limit_bytes=64 * 1024 * 1024,
        ),
        cost_estimate=pl.CostEstimate(flops=flops,
                                      transcendentals=transcendentals,
                                      bytes_accessed=bytes_accessed),
    )(x, mask,
      kp["wqkv"], kp["bqkv"], kp["wo"], kp["bo"],
      kp["g1"], kp["be1"], kp["g2"], kp["be2"],
      kp["w1"], kp["b1"], kp["w2"], kp["b2"],
      kp["gf"], kp["bf"], kp["wout"], kp["bout"])


@functools.partial(jax.jit, static_argnames=("num_heads", "vocab_size", "tile_batch"))
def language_model_forward(src, kp, *, num_heads, vocab_size, tile_batch=1):
    """src: (B, S) int32 token ids -> logits (B, S, vocab) float32."""
    B, S = src.shape
    D = kp["embedding"].shape[1]
    assert B % tile_batch == 0

    # Embedding gathers stay in XLA (glue around the kernel).
    tok_emb = jnp.take(kp["embedding"], src, axis=0)            # (B, S, D)
    pos_emb = kp["pos_embedding"][:S][None, :, :]               # positions = arange(S)
    x = (tok_emb + pos_emb).astype(jnp.float32).reshape(B * S, D)

    # Additive causal mask, hoisted out of the kernel (large finite negative, not -inf,
    # so any future kv-tiling / reordering stays NaN-free).
    r = jnp.arange(S)
    mask = jnp.where(r[None, :] > r[:, None], -1e30, 0.0).astype(jnp.float32)

    logits_padded = _fused_transformer(x, mask, kp, B, S, num_heads, tile_batch)
    return logits_padded[:, :vocab_size].reshape(B, S, vocab_size)


# -----------------------------------------------------------------------------
# Parameters: PyTorch-layout construction + one-time repacking for the kernel
# -----------------------------------------------------------------------------
def make_pytorch_params(key, vocab_size, dim_size, dim_feedforward, num_layers,
                        max_len, pad_id):
    """Synthetic params with exactly the PyTorch module's shapes/layouts."""
    keys = iter(jax.random.split(key, 4 + 8 * num_layers))
    scale = 0.02

    def rnd(shape):
        return (scale * jax.random.normal(next(keys), shape)).astype(jnp.float32)

    emb = rnd((vocab_size, dim_size)).at[pad_id].set(0.0)       # padding_idx row is zero
    pos = rnd((max_len, dim_size))

    layers = []
    for _ in range(num_layers):
        layers.append(dict(
            in_proj_weight=rnd((3 * dim_size, dim_size)),       # (3D, D)  (Wq;Wk;Wv)
            in_proj_bias=rnd((3 * dim_size,)),
            out_proj_weight=rnd((dim_size, dim_size)),           # (D, D)
            out_proj_bias=rnd((dim_size,)),
            norm1_weight=jnp.ones((dim_size,), jnp.float32),
            norm1_bias=jnp.zeros((dim_size,), jnp.float32),
            norm2_weight=jnp.ones((dim_size,), jnp.float32),
            norm2_bias=jnp.zeros((dim_size,), jnp.float32),
            linear1_weight=rnd((dim_feedforward, dim_size)),     # (F, D)
            linear1_bias=rnd((dim_feedforward,)),
            linear2_weight=rnd((dim_size, dim_feedforward)),     # (D, F)
            linear2_bias=rnd((dim_size,)),
        ))

    return dict(embedding=emb, pos_embedding=pos, layers=layers,
                final_weight=jnp.ones((dim_size,), jnp.float32),   # final LayerNorm
                final_bias=jnp.zeros((dim_size,), jnp.float32),
                out_weight=rnd((vocab_size, dim_size)),            # output Linear
                out_bias=rnd((vocab_size,)))


def pack_params(p, num_heads):
    """One-time (XLA-side) repack: stack over layers, pre-transpose to (in, out),
    fuse QKV into one (D, 3D) weight with the 1/sqrt(Dh) scale folded into the Q slice,
    cast matmul weights to bf16, pad vocab to a multiple of 128."""
    layers = p["layers"]
    L = len(layers)
    D = p["embedding"].shape[1]
    H = num_heads
    Dh = D // H
    V = p["out_weight"].shape[0]
    Vp = max(128, ((V + 127) // 128) * 128)
    bf16 = jnp.bfloat16
    scale = 1.0 / math.sqrt(Dh)

    def stack(name):
        return jnp.stack([lyr[name] for lyr in layers], axis=0)

    in_w = stack("in_proj_weight")                  # (L, 3D, D), rows = [Wq; Wk; Wv]
    in_b = stack("in_proj_bias")                    # (L, 3D)

    # Fold the attention scale into the Q projection (weights + bias).
    in_w = in_w.at[:, :D, :].multiply(scale)
    in_b = in_b.at[:, :D].multiply(scale)

    wqkv = jnp.swapaxes(in_w, 1, 2).astype(bf16)    # (L, D, 3D), out dim = [Q | K | V]
    bqkv = in_b[:, None, :].astype(jnp.float32)     # (L, 1, 3D)

    # out-proj: ctx (heads contiguous along lane) @ W.T  -> pre-transpose to (D, D)
    wo = jnp.swapaxes(stack("out_proj_weight"), 1, 2).astype(bf16)   # (L, D, D)
    bo = stack("out_proj_bias")[:, None, :]

    g1 = stack("norm1_weight")[:, None, :]
    be1 = stack("norm1_bias")[:, None, :]
    g2 = stack("norm2_weight")[:, None, :]
    be2 = stack("norm2_bias")[:, None, :]

    w1 = jnp.swapaxes(stack("linear1_weight"), 1, 2).astype(bf16)    # (L, D, F)
    b1 = stack("linear1_bias")[:, None, :]                           # (L, 1, F)
    w2 = jnp.swapaxes(stack("linear2_weight"), 1, 2).astype(bf16)    # (L, F, D)
    b2 = stack("linear2_bias")[:, None, :]                           # (L, 1, D)

    wout = jnp.zeros((D, Vp), bf16).at[:, :V].set(p["out_weight"].T.astype(bf16))
    bout = jnp.zeros((1, Vp), jnp.float32).at[0, :V].set(p["out_bias"])

    return dict(embedding=p["embedding"], pos_embedding=p["pos_embedding"],
                wqkv=wqkv, bqkv=bqkv, wo=wo, bo=bo,
                g1=g1, be1=be1, g2=g2, be2=be2, w1=w1, b1=b1, w2=w2, b2=b2,
                gf=p["final_weight"][None, :], bf=p["final_bias"][None, :],
                wout=wout, bout=bout)


# -----------------------------------------------------------------------------
# Pure-JAX reference with exactly the PyTorch semantics (for a sanity check)
# -----------------------------------------------------------------------------
def _reference_forward(src, p, num_heads):
    B, S = src.shape
    D = p["embedding"].shape[1]
    H = num_heads
    Dh = D // H
    x = p["embedding"][src] + p["pos_embedding"][:S][None]
    r = jnp.arange(S)
    mask = jnp.where(r[None, :] > r[:, None], -1e30, 0.0)

    def ln(t, g, b, eps=1e-5):
        mu = t.mean(-1, keepdims=True)
        var = ((t - mu) ** 2).mean(-1, keepdims=True)
        return (t - mu) / jnp.sqrt(var + eps) * g + b

    for lyr in p["layers"]:
        qkv = x @ lyr["in_proj_weight"].T + lyr["in_proj_bias"]
        q, k, v = jnp.split(qkv, 3, axis=-1)
        heads = lambda t: t.reshape(B, S, H, Dh).transpose(0, 2, 1, 3)
        q, k, v = heads(q), heads(k), heads(v)
        s = jnp.einsum('bhqd,bhkd->bhqk', q, k) / math.sqrt(Dh) + mask
        a = jax.nn.softmax(s, axis=-1)
        ctx = jnp.einsum('bhqk,bhkd->bhqd', a, v).transpose(0, 2, 1, 3).reshape(B, S, D)
        attn = ctx @ lyr["out_proj_weight"].T + lyr["out_proj_bias"]
        x = ln(x + attn, lyr["norm1_weight"], lyr["norm1_bias"])
        h1 = jnp.maximum(x @ lyr["linear1_weight"].T + lyr["linear1_bias"], 0.0)
        ff = h1 @ lyr["linear2_weight"].T + lyr["linear2_bias"]
        x = ln(x + ff, lyr["norm2_weight"], lyr["norm2_bias"])
    x = ln(x, p["final_weight"], p["final_bias"])
    return x @ p["out_weight"].T + p["out_bias"]


# -----------------------------------------------------------------------------
if __name__ == "__main__":
    # small config consistent with the module
    vocab_size = 64
    dim_size = 32
    dim_feedforward = 64
    num_layers = 2
    num_heads = 4
    max_len = 16
    pad_id = 0

    batch, seq_len = 2, 8

    key = jax.random.PRNGKey(0)
    k_param, k_src = jax.random.split(key)
    pt_params = make_pytorch_params(k_param, vocab_size, dim_size, dim_feedforward,
                                    num_layers, max_len, pad_id)
    kparams = pack_params(pt_params, num_heads)
    src = jax.random.randint(k_src, (batch, seq_len), 0, vocab_size, dtype=jnp.int32)

    logits = language_model_forward(src, kparams, num_heads=num_heads,
                                    vocab_size=vocab_size, tile_batch=1)
    logits = jax.block_until_ready(logits)
    assert logits.shape == (batch, seq_len, vocab_size)
    assert bool(jnp.all(jnp.isfinite(logits)))

    # Sanity check against a pure-JAX f32 reference (bf16 / approx-recip tolerance).
    ref = _reference_forward(src, pt_params, num_heads)
    assert bool(jnp.allclose(logits, ref, atol=5e-2, rtol=5e-2)), (
        float(jnp.max(jnp.abs(logits - ref))))

    print("KERNEL_OK")
</pallas_src>

<mosaic_0001>
module attributes {stable_mosaic.version = 11 : i64} {
  func.func @_lm_kernel(%arg0: i32, %arg1: i32, %arg2: memref<8x32xf32, #tpu.memory_space<vmem>>, %arg3: memref<8x8xf32, #tpu.memory_space<vmem>>, %arg4: memref<1x32x96xbf16, #tpu.memory_space<vmem>>, %arg5: memref<1x1x96xf32, #tpu.memory_space<vmem>>, %arg6: memref<1x32x32xbf16, #tpu.memory_space<vmem>>, %arg7: memref<1x1x32xf32, #tpu.memory_space<vmem>>, %arg8: memref<1x1x32xf32, #tpu.memory_space<vmem>>, %arg9: memref<1x1x32xf32, #tpu.memory_space<vmem>>, %arg10: memref<1x1x32xf32, #tpu.memory_space<vmem>>, %arg11: memref<1x1x32xf32, #tpu.memory_space<vmem>>, %arg12: memref<1x32x64xbf16, #tpu.memory_space<vmem>>, %arg13: memref<1x1x64xf32, #tpu.memory_space<vmem>>, %arg14: memref<1x64x32xbf16, #tpu.memory_space<vmem>>, %arg15: memref<1x1x32xf32, #tpu.memory_space<vmem>>, %arg16: memref<1x32xf32, #tpu.memory_space<vmem>>, %arg17: memref<1x32xf32, #tpu.memory_space<vmem>>, %arg18: memref<32x128xbf16, #tpu.memory_space<vmem>>, %arg19: memref<1x128xf32, #tpu.memory_space<vmem>>, %arg20: memref<8x128xf32, #tpu.memory_space<vmem>>, %arg21: memref<8x32xf32, #tpu.memory_space<vmem>>) attributes {dimension_semantics = [#tpu.dimension_semantics<parallel>, #tpu.dimension_semantics<arbitrary>], iteration_bounds = array<i64: 2, 2>, scalar_prefetch = 0 : i64, scratch_operands = 1 : i64, tpu.core_type = #tpu.core_type<tc>, window_params = [{transform_indices = @transform_0, window_bounds = array<i64: 8, 32>}, {pipeline_mode = #tpu.pipeline_mode<synchronous>, transform_indices = @transform_1, window_bounds = array<i64: 8, 8>}, {transform_indices = @transform_2, window_bounds = array<i64: 1, 32, 96>}, {transform_indices = @transform_3, window_bounds = array<i64: 1, 1, 96>}, {transform_indices = @transform_4, window_bounds = array<i64: 1, 32, 32>}, {transform_indices = @transform_5, window_bounds = array<i64: 1, 1, 32>}, {transform_indices = @transform_6, window_bounds = array<i64: 1, 1, 32>}, {transform_indices = @transform_7, window_bounds = array<i64: 1, 1, 32>}, {transform_indices = @transform_8, window_bounds = array<i64: 1, 1, 32>}, {transform_indices = @transform_9, window_bounds = array<i64: 1, 1, 32>}, {transform_indices = @transform_10, window_bounds = array<i64: 1, 32, 64>}, {transform_indices = @transform_11, window_bounds = array<i64: 1, 1, 64>}, {transform_indices = @transform_12, window_bounds = array<i64: 1, 64, 32>}, {transform_indices = @transform_13, window_bounds = array<i64: 1, 1, 32>}, {pipeline_mode = #tpu.pipeline_mode<synchronous>, transform_indices = @transform_14, window_bounds = array<i64: 1, 32>}, {pipeline_mode = #tpu.pipeline_mode<synchronous>, transform_indices = @transform_15, window_bounds = array<i64: 1, 32>}, {pipeline_mode = #tpu.pipeline_mode<synchronous>, transform_indices = @transform_16, window_bounds = array<i64: 32, 128>}, {pipeline_mode = #tpu.pipeline_mode<synchronous>, transform_indices = @transform_17, window_bounds = array<i64: 1, 128>}, {transform_indices = @transform_18, window_bounds = array<i64: 8, 128>}]} {
    %c0_i32 = arith.constant 0 : i32
    %0 = arith.cmpi eq, %arg1, %c0_i32 : i32
    %1 = arith.extui %0 : i1 to i32
    %c0_i32_0 = arith.constant 0 : i32
    %2 = arith.cmpi ne, %1, %c0_i32_0 : i32
    scf.if %2 {
      %c0_73 = arith.constant 0 : index
      %c0_74 = arith.constant 0 : index
      %184 = vector.load %arg2[%c0_73, %c0_74] : memref<8x32xf32, #tpu.memory_space<vmem>>, vector<8x32xf32>
      %c0_75 = arith.constant 0 : index
      %c0_76 = arith.constant 0 : index
      %185 = vector.load %arg21[%c0_75, %c0_76] : memref<8x32xf32, #tpu.memory_space<vmem>>, vector<8x32xf32>
      tpu.vector_store %arg21[%c0_75, %c0_76], %184 {strides = array<i32>} : memref<8x32xf32, #tpu.memory_space<vmem>>, vector<8x32xf32>,
    } else {
    }
    %c0 = arith.constant 0 : index
    %c0_1 = arith.constant 0 : index
    %3 = vector.load %arg21[%c0, %c0_1] : memref<8x32xf32, #tpu.memory_space<vmem>>, vector<8x32xf32>
    %4 = arith.truncf %3 : vector<8x32xf32> to vector<8x32xbf16>
    %c0_2 = arith.constant 0 : index
    %c0_3 = arith.constant 0 : index
    %5 = vector.load %arg3[%c0_2, %c0_3] : memref<8x8xf32, #tpu.memory_space<vmem>>, vector<8x8xf32>
    %c0_4 = arith.constant 0 : index
    %c0_5 = arith.constant 0 : index
    %c0_6 = arith.constant 0 : index
    %6 = vector.load %arg4[%c0_4, %c0_5, %c0_6] : memref<1x32x96xbf16, #tpu.memory_space<vmem>>, vector<1x32x96xbf16>
    %7 = vector.shape_cast %6 : vector<1x32x96xbf16> to vector<32x96xbf16>
    %cst = arith.constant dense<0.000000e+00> : vector<8x96xf32>
    %8 = tpu.matmul %4, %7, %cst {dimension_numbers = #tpu.dot_dimension_numbers<[1], [0], [0], [1], [0, 0, 1, 1], [], []>} : vector<8x32xbf16>, vector<32x96xbf16>, vector<8x96xf32> -> vector<8x96xf32>
    %c0_7 = arith.constant 0 : index
    %c0_8 = arith.constant 0 : index
    %c0_9 = arith.constant 0 : index
    %9 = vector.load %arg5[%c0_7, %c0_8, %c0_9] : memref<1x1x96xf32, #tpu.memory_space<vmem>>, vector<1x1x96xf32>
    %10 = vector.shape_cast %9 : vector<1x1x96xf32> to vector<1x96xf32>
    %11 = vector.broadcast %10 : vector<1x96xf32> to vector<8x96xf32>
    %12 = arith.addf %8, %11 : vector<8x96xf32>
    %13 = arith.truncf %12 : vector<8x96xf32> to vector<8x96xbf16>
    %14 = vector.extract_strided_slice %13 {offsets = [0, 0], sizes = [8, 8], strides = [1, 1]} : vector<8x96xbf16> to vector<8x8xbf16>
    %15 = vector.shape_cast %14 : vector<8x8xbf16> to vector<1x8x8xbf16>
    %16 = vector.extract_strided_slice %13 {offsets = [0, 32], sizes = [8, 8], strides = [1, 1]} : vector<8x96xbf16> to vector<8x8xbf16>
    %17 = vector.shape_cast %16 : vector<8x8xbf16> to vector<1x8x8xbf16>
    %18 = vector.extract_strided_slice %13 {offsets = [0, 64], sizes = [8, 8], strides = [1, 1]} : vector<8x96xbf16> to vector<8x8xbf16>
    %19 = vector.shape_cast %18 : vector<8x8xbf16> to vector<1x8x8xbf16>
    "tpu.trace_start"() <{level = 10 : i32, message = "bqd,bkd->bqk"}> : () -> ()
    %cst_10 = arith.constant dense<0.000000e+00> : vector<1x8x8xf32>
    %20 = tpu.matmul %15, %17, %cst_10 {dimension_numbers = #tpu.dot_dimension_numbers<[2], [2], [1], [1], [0, 0, 0, 1, 1, 1], [0], [0]>} : vector<1x8x8xbf16>, vector<1x8x8xbf16>, vector<1x8x8xf32> -> vector<1x8x8xf32>
    "tpu.trace_stop"() : () -> ()
    %21 = vector.shape_cast %5 : vector<8x8xf32> to vector<1x8x8xf32>
    %22 = arith.addf %20, %21 : vector<1x8x8xf32>
    %cst_11 = arith.constant dense<0xFF800000> : vector<1x8xf32>
    %23 = vector.multi_reduction <maximumf>, %22, %cst_11 [2] : vector<1x8x8xf32> to vector<1x8xf32>
    %24 = vector.shape_cast %23 : vector<1x8xf32> to vector<1x8x1xf32>
    %25 = vector.broadcast %24 : vector<1x8x1xf32> to vector<1x8x8xf32>
    %26 = arith.subf %22, %25 : vector<1x8x8xf32>
    %27 = math.exp %26 : vector<1x8x8xf32>
    %cst_12 = arith.constant dense<0.000000e+00> : vector<1x8xf32>
    %28 = vector.multi_reduction <add>, %27, %cst_12 [2] : vector<1x8x8xf32> to vector<1x8xf32>
    %29 = vector.shape_cast %28 : vector<1x8xf32> to vector<1x8x1xf32>
    %30 = tpu.reciprocal %29 {approx = true} : vector<1x8x1xf32> -> vector<1x8x1xf32>
    %31 = vector.broadcast %30 : vector<1x8x1xf32> to vector<1x8x8xf32>
    %32 = arith.mulf %27, %31 : vector<1x8x8xf32>
    %33 = arith.truncf %32 : vector<1x8x8xf32> to vector<1x8x8xbf16>
    "tpu.trace_start"() <{level = 10 : i32, message = "bqk,bkd->bqd"}> : () -> ()
    %cst_13 = arith.constant dense<0.000000e+00> : vector<1x8x8xf32>
    %34 = tpu.matmul %33, %19, %cst_13 {dimension_numbers = #tpu.dot_dimension_numbers<[2], [1], [1], [2], [0, 0, 0, 1, 1, 2], [0], [0]>} : vector<1x8x8xbf16>, vector<1x8x8xbf16>, vector<1x8x8xf32> -> vector<1x8x8xf32>
    "tpu.trace_stop"() : () -> ()
    %35 = vector.extract_strided_slice %13 {offsets = [0, 8], sizes = [8, 8], strides = [1, 1]} : vector<8x96xbf16> to vector<8x8xbf16>
    %36 = vector.shape_cast %35 : vector<8x8xbf16> to vector<1x8x8xbf16>
    %37 = vector.extract_strided_slice %13 {offsets = [0, 40], sizes = [8, 8], strides = [1, 1]} : vector<8x96xbf16> to vector<8x8xbf16>
    %38 = vector.shape_cast %37 : vector<8x8xbf16> to vector<1x8x8xbf16>
    %39 = vector.extract_strided_slice %13 {offsets = [0, 72], sizes = [8, 8], strides = [1, 1]} : vector<8x96xbf16> to vector<8x8xbf16>
    %40 = vector.shape_cast %39 : vector<8x8xbf16> to vector<1x8x8xbf16>
    "tpu.trace_start"() <{level = 10 : i32, message = "bqd,bkd->bqk"}> : () -> ()
    %cst_14 = arith.constant dense<0.000000e+00> : vector<1x8x8xf32>
    %41 = tpu.matmul %36, %38, %cst_14 {dimension_numbers = #tpu.dot_dimension_numbers<[2], [2], [1], [1], [0, 0, 0, 1, 1, 1], [0], [0]>} : vector<1x8x8xbf16>, vector<1x8x8xbf16>, vector<1x8x8xf32> -> vector<1x8x8xf32>
    "tpu.trace_stop"() : () -> ()
    %42 = vector.shape_cast %5 : vector<8x8xf32> to vector<1x8x8xf32>
    %43 = arith.addf %41, %42 : vector<1x8x8xf32>
    %cst_15 = arith.constant dense<0xFF800000> : vector<1x8xf32>
    %44 = vector.multi_reduction <maximumf>, %43, %cst_15 [2] : vector<1x8x8xf32> to vector<1x8xf32>
    %45 = vector.shape_cast %44 : vector<1x8xf32> to vector<1x8x1xf32>
    %46 = vector.broadcast %45 : vector<1x8x1xf32> to vector<1x8x8xf32>
    %47 = arith.subf %43, %46 : vector<1x8x8xf32>
    %48 = math.exp %47 : vector<1x8x8xf32>
    %cst_16 = arith.constant dense<0.000000e+00> : vector<1x8xf32>
    %49 = vector.multi_reduction <add>, %48, %cst_16 [2] : vector<1x8x8xf32> to vector<1x8xf32>
    %50 = vector.shape_cast %49 : vector<1x8xf32> to vector<1x8x1xf32>
    %51 = tpu.reciprocal %50 {approx = true} : vector<1x8x1xf32> -> vector<1x8x1xf32>
    %52 = vector.broadcast %51 : vector<1x8x1xf32> to vector<1x8x8xf32>
    %53 = arith.mulf %48, %52 : vector<1x8x8xf32>
    %54 = arith.truncf %53 : vector<1x8x8xf32> to vector<1x8x8xbf16>
    "tpu.trace_start"() <{level = 10 : i32, message = "bqk,bkd->bqd"}> : () -> ()
    %cst_17 = arith.constant dense<0.000000e+00> : vector<1x8x8xf32>
    %55 = tpu.matmul %54, %40, %cst_17 {dimension_numbers = #tpu.dot_dimension_numbers<[2], [1], [1], [2], [0, 0, 0, 1, 1, 2], [0], [0]>} : vector<1x8x8xbf16>, vector<1x8x8xbf16>, vector<1x8x8xf32> -> vector<1x8x8xf32>
    "tpu.trace_stop"() : () -> ()
    %56 = vector.extract_strided_slice %13 {offsets = [0, 16], sizes = [8, 8], strides = [1, 1]} : vector<8x96xbf16> to vector<8x8xbf16>
    %57 = vector.shape_cast %56 : vector<8x8xbf16> to vector<1x8x8xbf16>
    %58 = vector.extract_strided_slice %13 {offsets = [0, 48], sizes = [8, 8], strides = [1, 1]} : vector<8x96xbf16> to vector<8x8xbf16>
    %59 = vector.shape_cast %58 : vector<8x8xbf16> to vector<1x8x8xbf16>
    %60 = vector.extract_strided_slice %13 {offsets = [0, 80], sizes = [8, 8], strides = [1, 1]} : vector<8x96xbf16> to vector<8x8xbf16>
    %61 = vector.shape_cast %60 : vector<8x8xbf16> to vector<1x8x8xbf16>
    "tpu.trace_start"() <{level = 10 : i32, message = "bqd,bkd->bqk"}> : () -> ()
    %cst_18 = arith.constant dense<0.000000e+00> : vector<1x8x8xf32>
    %62 = tpu.matmul %57, %59, %cst_18 {dimension_numbers = #tpu.dot_dimension_numbers<[2], [2], [1], [1], [0, 0, 0, 1, 1, 1], [0], [0]>} : vector<1x8x8xbf16>, vector<1x8x8xbf16>, vector<1x8x8xf32> -> vector<1x8x8xf32>
    "tpu.trace_stop"() : () -> ()
    %63 = vector.shape_cast %5 : vector<8x8xf32> to vector<1x8x8xf32>
    %64 = arith.addf %62, %63 : vector<1x8x8xf32>
    %cst_19 = arith.constant dense<0xFF800000> : vector<1x8xf32>
    %65 = vector.multi_reduction <maximumf>, %64, %cst_19 [2] : vector<1x8x8xf32> to vector<1x8xf32>
    %66 = vector.shape_cast %65 : vector<1x8xf32> to vector<1x8x1xf32>
    %67 = vector.broadcast %66 : vector<1x8x1xf32> to vector<1x8x8xf32>
    %68 = arith.subf %64, %67 : vector<1x8x8xf32>
    %69 = math.exp %68 : vector<1x8x8xf32>
    %cst_20 = arith.constant dense<0.000000e+00> : vector<1x8xf32>
    %70 = vector.multi_reduction <add>, %69, %cst_20 [2] : vector<1x8x8xf32> to vector<1x8xf32>
    %71 = vector.shape_cast %70 : vector<1x8xf32> to vector<1x8x1xf32>
    %72 = tpu.reciprocal %71 {approx = true} : vector<1x8x1xf32> -> vector<1x8x1xf32>
    %73 = vector.broadcast %72 : vector<1x8x1xf32> to vector<1x8x8xf32>
    %74 = arith.mulf %69, %73 : vector<1x8x8xf32>
    %75 = arith.truncf %74 : vector<1x8x8xf32> to vector<1x8x8xbf16>
    "tpu.trace_start"() <{level = 10 : i32, message = "bqk,bkd->bqd"}> : () -> ()
    %cst_21 = arith.constant dense<0.000000e+00> : vector<1x8x8xf32>
    %76 = tpu.matmul %75, %61, %cst_21 {dimension_numbers = #tpu.dot_dimension_numbers<[2], [1], [1], [2], [0, 0, 0, 1, 1, 2], [0], [0]>} : vector<1x8x8xbf16>, vector<1x8x8xbf16>, vector<1x8x8xf32> -> vector<1x8x8xf32>
    "tpu.trace_stop"() : () -> ()
    %77 = vector.extract_strided_slice %13 {offsets = [0, 24], sizes = [8, 8], strides = [1, 1]} : vector<8x96xbf16> to vector<8x8xbf16>
    %78 = vector.shape_cast %77 : vector<8x8xbf16> to vector<1x8x8xbf16>
    %79 = vector.extract_strided_slice %13 {offsets = [0, 56], sizes = [8, 8], strides = [1, 1]} : vector<8x96xbf16> to vector<8x8xbf16>
    %80 = vector.shape_cast %79 : vector<8x8xbf16> to vector<1x8x8xbf16>
    %81 = vector.extract_strided_slice %13 {offsets = [0, 88], sizes = [8, 8], strides = [1, 1]} : vector<8x96xbf16> to vector<8x8xbf16>
    %82 = vector.shape_cast %81 : vector<8x8xbf16> to vector<1x8x8xbf16>
    "tpu.trace_start"() <{level = 10 : i32, message = "bqd,bkd->bqk"}> : () -> ()
    %cst_22 = arith.constant dense<0.000000e+00> : vector<1x8x8xf32>
    %83 = tpu.matmul %78, %80, %cst_22 {dimension_numbers = #tpu.dot_dimension_numbers<[2], [2], [1], [1], [0, 0, 0, 1, 1, 1], [0], [0]>} : vector<1x8x8xbf16>, vector<1x8x8xbf16>, vector<1x8x8xf32> -> vector<1x8x8xf32>
    "tpu.trace_stop"() : () -> ()
    %84 = vector.shape_cast %5 : vector<8x8xf32> to vector<1x8x8xf32>
    %85 = arith.addf %83, %84 : vector<1x8x8xf32>
    %cst_23 = arith.constant dense<0xFF800000> : vector<1x8xf32>
    %86 = vector.multi_reduction <maximumf>, %85, %cst_23 [2] : vector<1x8x8xf32> to vector<1x8xf32>
    %87 = vector.shape_cast %86 : vector<1x8xf32> to vector<1x8x1xf32>
    %88 = vector.broadcast %87 : vector<1x8x1xf32> to vector<1x8x8xf32>
    %89 = arith.subf %85, %88 : vector<1x8x8xf32>
    %90 = math.exp %89 : vector<1x8x8xf32>
    %cst_24 = arith.constant dense<0.000000e+00> : vector<1x8xf32>
    %91 = vector.multi_reduction <add>, %90, %cst_24 [2] : vector<1x8x8xf32> to vector<1x8xf32>
    %92 = vector.shape_cast %91 : vector<1x8xf32> to vector<1x8x1xf32>
    %93 = tpu.reciprocal %92 {approx = true} : vector<1x8x1xf32> -> vector<1x8x1xf32>
    %94 = vector.broadcast %93 : vector<1x8x1xf32> to vector<1x8x8xf32>
    %95 = arith.mulf %90, %94 : vector<1x8x8xf32>
    %96 = arith.truncf %95 : vector<1x8x8xf32> to vector<1x8x8xbf16>
    "tpu.trace_start"() <{level = 10 : i32, message = "bqk,bkd->bqd"}> : () -> ()
    %cst_25 = arith.constant dense<0.000000e+00> : vector<1x8x8xf32>
    %97 = tpu.matmul %96, %82, %cst_25 {dimension_numbers = #tpu.dot_dimension_numbers<[2], [1], [1], [2], [0, 0, 0, 1, 1, 2], [0], [0]>} : vector<1x8x8xbf16>, vector<1x8x8xbf16>, vector<1x8x8xf32> -> vector<1x8x8xf32>
    "tpu.trace_stop"() : () -> ()
    %98 = tpu.concatenate %34, %55, %76, %97 in 2 : vector<1x8x8xf32>, vector<1x8x8xf32>, vector<1x8x8xf32>, vector<1x8x8xf32> -> vector<1x8x32xf32>
    %99 = vector.shape_cast %98 : vector<1x8x32xf32> to vector<8x32xf32>
    %100 = arith.truncf %99 : vector<8x32xf32> to vector<8x32xbf16>
    %c0_26 = arith.constant 0 : index
    %c0_27 = arith.constant 0 : index
    %c0_28 = arith.constant 0 : index
    %101 = vector.load %arg6[%c0_26, %c0_27, %c0_28] : memref<1x32x32xbf16, #tpu.memory_space<vmem>>, vector<1x32x32xbf16>
    %102 = vector.shape_cast %101 : vector<1x32x32xbf16> to vector<32x32xbf16>
    %cst_29 = arith.constant dense<0.000000e+00> : vector<8x32xf32>
    %103 = tpu.matmul %100, %102, %cst_29 {dimension_numbers = #tpu.dot_dimension_numbers<[1], [0], [0], [1], [0, 0, 1, 1], [], []>} : vector<8x32xbf16>, vector<32x32xbf16>, vector<8x32xf32> -> vector<8x32xf32>
    %c0_30 = arith.constant 0 : index
    %c0_31 = arith.constant 0 : index
    %c0_32 = arith.constant 0 : index
    %104 = vector.load %arg7[%c0_30, %c0_31, %c0_32] : memref<1x1x32xf32, #tpu.memory_space<vmem>>, vector<1x1x32xf32>
    %105 = vector.shape_cast %104 : vector<1x1x32xf32> to vector<1x32xf32>
    %106 = vector.broadcast %105 : vector<1x32xf32> to vector<8x32xf32>
    %107 = arith.addf %103, %106 : vector<8x32xf32>
    %108 = arith.addf %3, %107 : vector<8x32xf32>
    %c0_33 = arith.constant 0 : index
    %c0_34 = arith.constant 0 : index
    %c0_35 = arith.constant 0 : index
    %109 = vector.load %arg8[%c0_33, %c0_34, %c0_35] : memref<1x1x32xf32, #tpu.memory_space<vmem>>, vector<1x1x32xf32>
    %110 = vector.shape_cast %109 : vector<1x1x32xf32> to vector<1x32xf32>
    %c0_36 = arith.constant 0 : index
    %c0_37 = arith.constant 0 : index
    %c0_38 = arith.constant 0 : index
    %111 = vector.load %arg9[%c0_36, %c0_37, %c0_38] : memref<1x1x32xf32, #tpu.memory_space<vmem>>, vector<1x1x32xf32>
    %112 = vector.shape_cast %111 : vector<1x1x32xf32> to vector<1x32xf32>
    %cst_39 = arith.constant dense<0.000000e+00> : vector<8xf32>
    %113 = vector.multi_reduction <add>, %108, %cst_39 [1] : vector<8x32xf32> to vector<8xf32>
    %114 = vector.shape_cast %113 : vector<8xf32> to vector<8x1xf32>
    %cst_40 = arith.constant 3.200000e+01 : f32
    %115 = vector.broadcast %cst_40 : f32 to vector<8x1xf32>
    %116 = arith.divf %114, %115 : vector<8x1xf32>
    %117 = vector.broadcast %116 : vector<8x1xf32> to vector<8x32xf32>
    %118 = arith.subf %108, %117 : vector<8x32xf32>
    %119 = arith.mulf %118, %118 : vector<8x32xf32>
    %cst_41 = arith.constant dense<0.000000e+00> : vector<8xf32>
    %120 = vector.multi_reduction <add>, %119, %cst_41 [1] : vector<8x32xf32> to vector<8xf32>
    %121 = vector.shape_cast %120 : vector<8xf32> to vector<8x1xf32>
    %cst_42 = arith.constant 3.200000e+01 : f32
    %122 = vector.broadcast %cst_42 : f32 to vector<8x1xf32>
    %123 = arith.divf %121, %122 : vector<8x1xf32>
    %124 = vector.broadcast %116 : vector<8x1xf32> to vector<8x32xf32>
    %125 = arith.subf %108, %124 : vector<8x32xf32>
    %cst_43 = arith.constant 9.99999974E-6 : f32
    %126 = vector.broadcast %cst_43 : f32 to vector<8x1xf32>
    %127 = arith.addf %123, %126 : vector<8x1xf32>
    %128 = math.rsqrt %127 : vector<8x1xf32>
    %129 = vector.broadcast %128 : vector<8x1xf32> to vector<8x32xf32>
    %130 = arith.mulf %125, %129 : vector<8x32xf32>
    %131 = vector.broadcast %110 : vector<1x32xf32> to vector<8x32xf32>
    %132 = arith.mulf %130, %131 : vector<8x32xf32>
    %133 = vector.broadcast %112 : vector<1x32xf32> to vector<8x32xf32>
    %134 = arith.addf %132, %133 : vector<8x32xf32>
    %135 = arith.truncf %134 : vector<8x32xf32> to vector<8x32xbf16>
    %c0_44 = arith.constant 0 : index
    %c0_45 = arith.constant 0 : index
    %c0_46 = arith.constant 0 : index
    %136 = vector.load %arg12[%c0_44, %c0_45, %c0_46] : memref<1x32x64xbf16, #tpu.memory_space<vmem>>, vector<1x32x64xbf16>
    %137 = vector.shape_cast %136 : vector<1x32x64xbf16> to vector<32x64xbf16>
    %cst_47 = arith.constant dense<0.000000e+00> : vector<8x64xf32>
    %138 = tpu.matmul %135, %137, %cst_47 {dimension_numbers = #tpu.dot_dimension_numbers<[1], [0], [0], [1], [0, 0, 1, 1], [], []>} : vector<8x32xbf16>, vector<32x64xbf16>, vector<8x64xf32> -> vector<8x64xf32>
    %c0_48 = arith.constant 0 : index
    %c0_49 = arith.constant 0 : index
    %c0_50 = arith.constant 0 : index
    %139 = vector.load %arg13[%c0_48, %c0_49, %c0_50] : memref<1x1x64xf32, #tpu.memory_space<vmem>>, vector<1x1x64xf32>
    %140 = vector.shape_cast %139 : vector<1x1x64xf32> to vector<1x64xf32>
    %141 = vector.broadcast %140 : vector<1x64xf32> to vector<8x64xf32>
    %142 = arith.addf %138, %141 : vector<8x64xf32>
    %cst_51 = arith.constant 0.000000e+00 : f32
    %143 = vector.broadcast %cst_51 : f32 to vector<8x64xf32>
    %144 = arith.maximumf %142, %143 : vector<8x64xf32>
    %145 = arith.truncf %144 : vector<8x64xf32> to vector<8x64xbf16>
    %c0_52 = arith.constant 0 : index
    %c0_53 = arith.constant 0 : index
    %c0_54 = arith.constant 0 : index
    %146 = vector.load %arg14[%c0_52, %c0_53, %c0_54] : memref<1x64x32xbf16, #tpu.memory_space<vmem>>, vector<1x64x32xbf16>
    %147 = vector.shape_cast %146 : vector<1x64x32xbf16> to vector<64x32xbf16>
    %cst_55 = arith.constant dense<0.000000e+00> : vector<8x32xf32>
    %148 = tpu.matmul %145, %147, %cst_55 {dimension_numbers = #tpu.dot_dimension_numbers<[1], [0], [0], [1], [0, 0, 1, 1], [], []>} : vector<8x64xbf16>, vector<64x32xbf16>, vector<8x32xf32> -> vector<8x32xf32>
    %c0_56 = arith.constant 0 : index
    %c0_57 = arith.constant 0 : index
    %c0_58 = arith.constant 0 : index
    %149 = vector.load %arg15[%c0_56, %c0_57, %c0_58] : memref<1x1x32xf32, #tpu.memory_space<vmem>>, vector<1x1x32xf32>
    %150 = vector.shape_cast %149 : vector<1x1x32xf32> to vector<1x32xf32>
    %151 = vector.broadcast %150 : vector<1x32xf32> to vector<8x32xf32>
    %152 = arith.addf %148, %151 : vector<8x32xf32>
    %153 = arith.addf %134, %152 : vector<8x32xf32>
    %c0_59 = arith.constant 0 : index
    %c0_60 = arith.constant 0 : index
    %c0_61 = arith.constant 0 : index
    %154 = vector.load %arg10[%c0_59, %c0_60, %c0_61] : memref<1x1x32xf32, #tpu.memory_space<vmem>>, vector<1x1x32xf32>
    %155 = vector.shape_cast %154 : vector<1x1x32xf32> to vector<1x32xf32>
    %c0_62 = arith.constant 0 : index
    %c0_63 = arith.constant 0 : index
    %c0_64 = arith.constant 0 : index
    %156 = vector.load %arg11[%c0_62, %c0_63, %c0_64] : memref<1x1x32xf32, #tpu.memory_space<vmem>>, vector<1x1x32xf32>
    %157 = vector.shape_cast %156 : vector<1x1x32xf32> to vector<1x32xf32>
    %cst_65 = arith.constant dense<0.000000e+00> : vector<8xf32>
    %158 = vector.multi_reduction <add>, %153, %cst_65 [1] : vector<8x32xf32> to vector<8xf32>
    %159 = vector.shape_cast %158 : vector<8xf32> to vector<8x1xf32>
    %cst_66 = arith.constant 3.200000e+01 : f32
    %160 = vector.broadcast %cst_66 : f32 to vector<8x1xf32>
    %161 = arith.divf %159, %160 : vector<8x1xf32>
    %162 = vector.broadcast %161 : vector<8x1xf32> to vector<8x32xf32>
    %163 = arith.subf %153, %162 : vector<8x32xf32>
    %164 = arith.mulf %163, %163 : vector<8x32xf32>
    %cst_67 = arith.constant dense<0.000000e+00> : vector<8xf32>
    %165 = vector.multi_reduction <add>, %164, %cst_67 [1] : vector<8x32xf32> to vector<8xf32>
    %166 = vector.shape_cast %165 : vector<8xf32> to vector<8x1xf32>
    %cst_68 = arith.constant 3.200000e+01 : f32
    %167 = vector.broadcast %cst_68 : f32 to vector<8x1xf32>
    %168 = arith.divf %166, %167 : vector<8x1xf32>
    %169 = vector.broadcast %161 : vector<8x1xf32> to vector<8x32xf32>
    %170 = arith.subf %153, %169 : vector<8x32xf32>
    %cst_69 = arith.constant 9.99999974E-6 : f32
    %171 = vector.broadcast %cst_69 : f32 to vector<8x1xf32>
    %172 = arith.addf %168, %171 : vector<8x1xf32>
    %173 = math.rsqrt %172 : vector<8x1xf32>
    %174 = vector.broadcast %173 : vector<8x1xf32> to vector<8x32xf32>
    %175 = arith.mulf %170, %174 : vector<8x32xf32>
    %176 = vector.broadcast %155 : vector<1x32xf32> to vector<8x32xf32>
    %177 = arith.mulf %175, %176 : vector<8x32xf32>
    %178 = vector.broadcast %157 : vector<1x32xf32> to vector<8x32xf32>
    %179 = arith.addf %177, %178 : vector<8x32xf32>
    %c0_70 = arith.constant 0 : index
    %c0_71 = arith.constant 0 : index
    %180 = vector.load %arg21[%c0_70, %c0_71] : memref<8x32xf32, #tpu.memory_space<vmem>>, vector<8x32xf32>
    tpu.vector_store %arg21[%c0_70, %c0_71], %179 {strides = array<i32>} : memref<8x32xf32, #tpu.memory_space<vmem>>, vector<8x32xf32>,
    %c1_i32 = arith.constant 1 : i32
    %181 = arith.cmpi eq, %arg1, %c1_i32 : i32
    %182 = arith.extui %181 : i1 to i32
    %c0_i32_72 = arith.constant 0 : i32
    %183 = arith.cmpi ne, %182, %c0_i32_72 : i32
    scf.if %183 {
      %c0_73 = arith.constant 0 : index
      %c0_74 = arith.constant 0 : index
      %184 = vector.load %arg16[%c0_73, %c0_74] : memref<1x32xf32, #tpu.memory_space<vmem>>, vector<1x32xf32>
      %c0_75 = arith.constant 0 : index
      %c0_76 = arith.constant 0 : index
      %185 = vector.load %arg17[%c0_75, %c0_76] : memref<1x32xf32, #tpu.memory_space<vmem>>, vector<1x32xf32>
      %cst_77 = arith.constant dense<0.000000e+00> : vector<8xf32>
      %186 = vector.multi_reduction <add>, %179, %cst_77 [1] : vector<8x32xf32> to vector<8xf32>
      %187 = vector.shape_cast %186 : vector<8xf32> to vector<8x1xf32>
      %cst_78 = arith.constant 3.200000e+01 : f32
      %188 = vector.broadcast %cst_78 : f32 to vector<8x1xf32>
      %189 = arith.divf %187, %188 : vector<8x1xf32>
      %190 = vector.broadcast %189 : vector<8x1xf32> to vector<8x32xf32>
      %191 = arith.subf %179, %190 : vector<8x32xf32>
      %192 = arith.mulf %191, %191 : vector<8x32xf32>
      %cst_79 = arith.constant dense<0.000000e+00> : vector<8xf32>
      %193 = vector.multi_reduction <add>, %192, %cst_79 [1] : vector<8x32xf32> to vector<8xf32>
      %194 = vector.shape_cast %193 : vector<8xf32> to vector<8x1xf32>
      %cst_80 = arith.constant 3.200000e+01 : f32
      %195 = vector.broadcast %cst_80 : f32 to vector<8x1xf32>
      %196 = arith.divf %194, %195 : vector<8x1xf32>
      %197 = vector.broadcast %189 : vector<8x1xf32> to vector<8x32xf32>
      %198 = arith.subf %179, %197 : vector<8x32xf32>
      %cst_81 = arith.constant 9.99999974E-6 : f32
      %199 = vector.broadcast %cst_81 : f32 to vector<8x1xf32>
      %200 = arith.addf %196, %199 : vector<8x1xf32>
      %201 = math.rsqrt %200 : vector<8x1xf32>
      %202 = vector.broadcast %201 : vector<8x1xf32> to vector<8x32xf32>
      %203 = arith.mulf %198, %202 : vector<8x32xf32>
      %204 = vector.broadcast %184 : vector<1x32xf32> to vector<8x32xf32>
      %205 = arith.mulf %203, %204 : vector<8x32xf32>
      %206 = vector.broadcast %185 : vector<1x32xf32> to vector<8x32xf32>
      %207 = arith.addf %205, %206 : vector<8x32xf32>
      %208 = arith.truncf %207 : vector<8x32xf32> to vector<8x32xbf16>
      %c0_82 = arith.constant 0 : index
      %c0_83 = arith.constant 0 : index
      %209 = vector.load %arg18[%c0_82, %c0_83] : memref<32x128xbf16, #tpu.memory_space<vmem>>, vector<32x128xbf16>
      %cst_84 = arith.constant dense<0.000000e+00> : vector<8x128xf32>
      %210 = tpu.matmul %208, %209, %cst_84 {dimension_numbers = #tpu.dot_dimension_numbers<[1], [0], [0], [1], [0, 0, 1, 1], [], []>} : vector<8x32xbf16>, vector<32x128xbf16>, vector<8x128xf32> -> vector<8x128xf32>
      %c0_85 = arith.constant 0 : index
      %c0_86 = arith.constant 0 : index
      %211 = vector.load %arg19[%c0_85, %c0_86] : memref<1x128xf32, #tpu.memory_space<vmem>>, vector<1x128xf32>
      %212 = vector.broadcast %211 : vector<1x128xf32> to vector<8x128xf32>
      %213 = arith.addf %210, %212 : vector<8x128xf32>
      %c0_87 = arith.constant 0 : index
      %c0_88 = arith.constant 0 : index
      %214 = vector.load %arg20[%c0_87, %c0_88] : memref<8x128xf32, #tpu.memory_space<vmem>>, vector<8x128xf32>
      tpu.vector_store %arg20[%c0_87, %c0_88], %213 {strides = array<i32>} : memref<8x128xf32, #tpu.memory_space<vmem>>, vector<8x128xf32>,
    } else {
    }
    return
  }
  func.func @transform_0(%arg0: i32, %arg1: i32) -> (i32, i32) {
    %c0_i32 = arith.constant 0 : i32
    %c0_i32_0 = arith.constant 0 : i32
    return %arg0, %c0_i32 : i32, i32
  }
  func.func @transform_1(%arg0: i32, %arg1: i32) -> (i32, i32) {
    %c0_i32 = arith.constant 0 : i32
    %c0_i32_0 = arith.constant 0 : i32
    %c0_i32_1 = arith.constant 0 : i32
    return %c0_i32, %c0_i32_0 : i32, i32
  }
  func.func @transform_2(%arg0: i32, %arg1: i32) -> (i32, i32, i32) {
    %c0_i32 = arith.constant 0 : i32
    %c0_i32_0 = arith.constant 0 : i32
    %c0_i32_1 = arith.constant 0 : i32
    return %arg1, %c0_i32, %c0_i32_0 : i32, i32, i32
  }
  func.func @transform_3(%arg0: i32, %arg1: i32) -> (i32, i32, i32) {
    %c0_i32 = arith.constant 0 : i32
    %c0_i32_0 = arith.constant 0 : i32
    %c0_i32_1 = arith.constant 0 : i32
    return %arg1, %c0_i32, %c0_i32_0 : i32, i32, i32
  }
  func.func @transform_4(%arg0: i32, %arg1: i32) -> (i32, i32, i32) {
    %c0_i32 = arith.constant 0 : i32
    %c0_i32_0 = arith.constant 0 : i32
    %c0_i32_1 = arith.constant 0 : i32
    return %arg1, %c0_i32, %c0_i32_0 : i32, i32, i32
  }
  func.func @transform_5(%arg0: i32, %arg1: i32) -> (i32, i32, i32) {
    %c0_i32 = arith.constant 0 : i32
    %c0_i32_0 = arith.constant 0 : i32
    %c0_i32_1 = arith.constant 0 : i32
    return %arg1, %c0_i32, %c0_i32_0 : i32, i32, i32
  }
  func.func @transform_6(%arg0: i32, %arg1: i32) -> (i32, i32, i32) {
    %c0_i32 = arith.constant 0 : i32
    %c0_i32_0 = arith.constant 0 : i32
    %c0_i32_1 = arith.constant 0 : i32
    return %arg1, %c0_i32, %c0_i32_0 : i32, i32, i32
  }
  func.func @transform_7(%arg0: i32, %arg1: i32) -> (i32, i32, i32) {
    %c0_i32 = arith.constant 0 : i32
    %c0_i32_0 = arith.constant 0 : i32
    %c0_i32_1 = arith.constant 0 : i32
    return %arg1, %c0_i32, %c0_i32_0 : i32, i32, i32
  }
  func.func @transform_8(%arg0: i32, %arg1: i32) -> (i32, i32, i32) {
    %c0_i32 = arith.constant 0 : i32
    %c0_i32_0 = arith.constant 0 : i32
    %c0_i32_1 = arith.constant 0 : i32
    return %arg1, %c0_i32, %c0_i32_0 : i32, i32, i32
  }
  func.func @transform_9(%arg0: i32, %arg1: i32) -> (i32, i32, i32) {
    %c0_i32 = arith.constant 0 : i32
    %c0_i32_0 = arith.constant 0 : i32
    %c0_i32_1 = arith.constant 0 : i32
    return %arg1, %c0_i32, %c0_i32_0 : i32, i32, i32
  }
  func.func @transform_10(%arg0: i32, %arg1: i32) -> (i32, i32, i32) {
    %c0_i32 = arith.constant 0 : i32
    %c0_i32_0 = arith.constant 0 : i32
    %c0_i32_1 = arith.constant 0 : i32
    return %arg1, %c0_i32, %c0_i32_0 : i32, i32, i32
  }
  func.func @transform_11(%arg0: i32, %arg1: i32) -> (i32, i32, i32) {
    %c0_i32 = arith.constant 0 : i32
    %c0_i32_0 = arith.constant 0 : i32
    %c0_i32_1 = arith.constant 0 : i32
    return %arg1, %c0_i32, %c0_i32_0 : i32, i32, i32
  }
  func.func @transform_12(%arg0: i32, %arg1: i32) -> (i32, i32, i32) {
    %c0_i32 = arith.constant 0 : i32
    %c0_i32_0 = arith.constant 0 : i32
    %c0_i32_1 = arith.constant 0 : i32
    return %arg1, %c0_i32, %c0_i32_0 : i32, i32, i32
  }
  func.func @transform_13(%arg0: i32, %arg1: i32) -> (i32, i32, i32) {
    %c0_i32 = arith.constant 0 : i32
    %c0_i32_0 = arith.constant 0 : i32
    %c0_i32_1 = arith.constant 0 : i32
    return %arg1, %c0_i32, %c0_i32_0 : i32, i32, i32
  }
  func.func @transform_14(%arg0: i32, %arg1: i32) -> (i32, i32) {
    %c0_i32 = arith.constant 0 : i32
    %c0_i32_0 = arith.constant 0 : i32
    %c0_i32_1 = arith.constant 0 : i32
    return %c0_i32, %c0_i32_0 : i32, i32
  }
  func.func @transform_15(%arg0: i32, %arg1: i32) -> (i32, i32) {
    %c0_i32 = arith.constant 0 : i32
    %c0_i32_0 = arith.constant 0 : i32
    %c0_i32_1 = arith.constant 0 : i32
    return %c0_i32, %c0_i32_0 : i32, i32
  }
  func.func @transform_16(%arg0: i32, %arg1: i32) -> (i32, i32) {
    %c0_i32 = arith.constant 0 : i32
    %c0_i32_0 = arith.constant 0 : i32
    %c0_i32_1 = arith.constant 0 : i32
    return %c0_i32, %c0_i32_0 : i32, i32
  }
  func.func @transform_17(%arg0: i32, %arg1: i32) -> (i32, i32) {
    %c0_i32 = arith.constant 0 : i32
    %c0_i32_0 = arith.constant 0 : i32
    %c0_i32_1 = arith.constant 0 : i32
    return %c0_i32, %c0_i32_0 : i32, i32
  }
  func.func @transform_18(%arg0: i32, %arg1: i32) -> (i32, i32) {
    %c0_i32 = arith.constant 0 : i32
    %c0_i32_0 = arith.constant 0 : i32
    return %arg0, %c0_i32 : i32, i32
  }
}

</mosaic_0001>

<bundles_post_ra>
// kernel: language_model_forward.1
= control target key start
LH: loop header
LB: loop body
LE: loop exit
PB: predicated region body
PF: predicated region fallthrough
CT: control target
= control target key end

     0   :  { %s4550_s0 = inlined_call_operand.hbm [shape: f32[16,32], index: 0, kind: input, shape index: {}]   ;;  %s4551_s1 = inlined_call_operand.hbm [shape: f32[8,8], index: 1, kind: input, shape index: {}]   ;;  %s4552_s2 = inlined_call_operand.hbm [shape: bf16[2,32,96], index: 2, kind: input, shape index: {}]   ;;  %s4553_s3 = inlined_call_operand.hbm [shape: f32[2,1,96], index: 3, kind: input, shape index: {}]   ;;  %s4554_s4 = inlined_call_operand.hbm [shape: bf16[2,32,32], index: 4, kind: input, shape index: {}]   ;;  %s4555_s5 = inlined_call_operand.hbm [shape: f32[2,1,32], index: 5, kind: input, shape index: {}]   ;;  %s4556_s6 = inlined_call_operand.hbm [shape: f32[2,1,32], index: 6, kind: input, shape index: {}]   ;;  %s4557_s7 = inlined_call_operand.hbm [shape: f32[2,1,32], index: 7, kind: input, shape index: {}]   ;;  %s4558_s8 = inlined_call_operand.hbm [shape: f32[2,1,32], index: 8, kind: input, shape index: {}]   ;;  %s4559_s9 = inlined_call_operand.hbm [shape: f32[2,1,32], index: 9, kind: input, shape index: {}]   ;;  %s4560_s10 = inlined_call_operand.hbm [shape: bf16[2,32,64], index: 10, kind: input, shape index: {}]   ;;  %s4561_s11 = inlined_call_operand.hbm [shape: f32[2,1,64], index: 11, kind: input, shape index: {}]   ;;  %s4562_s12 = inlined_call_operand.hbm [shape: bf16[2,64,32], index: 12, kind: input, shape index: {}]   ;;  %s4563_s13 = inlined_call_operand.hbm [shape: f32[2,1,32], index: 13, kind: input, shape index: {}]   ;;  %s4564_s14 = inlined_call_operand.hbm [shape: f32[1,32], index: 14, kind: input, shape index: {}]   ;;  %s4565_s15 = inlined_call_operand.hbm [shape: f32[1,32], index: 15, kind: input, shape index: {}]   ;;  %s4566_s16 = inlined_call_operand.hbm [shape: bf16[32,128], index: 16, kind: input, shape index: {}]   ;;  %s4567_s17 = inlined_call_operand.hbm [shape: f32[1,128], index: 17, kind: input, shape index: {}]   ;;  %s4568_s18 = inlined_call_operand.hbm [shape: f32[16,128], index: 18, kind: output, shape index: {}]  }
   0x1   :  { %4622 = sst [smem:[#allocation52_spill]] %s4550_s0 }
   0x2   :  { %4623 = sst [smem:[#allocation53_spill]] %s4551_s1 }
   0x3   :  { %4624 = sst [smem:[#allocation54_spill]] %s4552_s2 }
   0x4   :  { %4625 = sst [smem:[#allocation55_spill]] %s4553_s3 }
   0x5   :  { %4626 = sst [smem:[#allocation56_spill]] %s4554_s4 }
   0x6   :  { %4627 = sst [smem:[#allocation57_spill]] %s4555_s5 }
   0x7   :  { %4628 = sst [smem:[#allocation58_spill]] %s4556_s6 }
   0x8   :  { %4629 = sst [smem:[#allocation59_spill]] %s4557_s7 }
   0x9   :  { %4630 = sst [smem:[#allocation60_spill]] %s4558_s8 }
   0xa   :  { %4631 = sst [smem:[#allocation61_spill]] %s4559_s9 }
   0xb   :  { %4632 = sst [smem:[#allocation62_spill]] %s4560_s10 }
   0xc   :  { %4633 = sst [smem:[#allocation63_spill]] %s4561_s11 }
   0xd   :  { %4634 = sst [smem:[#allocation64_spill]] %s4562_s12 }
   0xe   :  { %4635 = sst [smem:[#allocation65_spill]] %s4563_s13 }
   0xf   :  { %4636 = sst [smem:[#allocation66_spill]] %s4564_s14 }
  0x10   :  { %4637 = sst [smem:[#allocation67_spill]] %s4565_s15 }
  0x11   :  { %4638 = sst [smem:[#allocation68_spill]] %s4566_s16 }
  0x12   :  { %4639 = sst [smem:[#allocation69_spill]] %s4567_s17 }
  0x13   :  { %4640 = sst [smem:[#allocation70_spill]] %s4568_s18 }
  0x14   :  { %23 = vsyncpa [#allocation4], 0 }
  0x15   :  { %25 = vsyncpa [#allocation4 + $0x1], 0 }
  0x16   :  { %26 = vsyncpa [#allocation7], 0 }
  0x17   :  { %27 = vsyncpa [#allocation22], 0 }
  0x18   :  { %28 = vsyncpa [#allocation25], 0 }
  0x19   :  { %29 = vsyncpa [#allocation5], 0 }
  0x1a   :  { %31 = vsyncpa [#allocation5 + $0x1], 0  ;;  %s3631_s27 = smov 0   ;;  %s3633_s28 = smov 0  }
  0x1b   :  { %s3635_s29 = smov 0   ;;  %s3637_s30 = smov 0  }
  0x1c   :  { %s3639_s0 = smov 0   ;;  %s3641_s19 = smov 0  }
  0x1d   :  { %s3643_s1 = smov 0   ;;  %s3645_s20 = smov 0  }
  0x1e   :  { %s3647_s21 = smov 0   ;;  %s3649_s22 = smov 0  }
  0x1f   :  { %s3651_s2 = smov 0  }
  0x20 LB: > { %4641 = sst [smem:[#allocation34_spill]] %s3459_s28  ;;  %s3687_s23 = sadd.s32 4294967295, %s3495_s2   ;;  %s3495_s2 = sphi %s3651_s2, %s37_s2   ;;  %s3491_s22 = sphi %s3649_s22, %s4746_s22   ;;  %s3487_s21 = sphi %s3647_s21, %s4745_s21   ;;  %s3483_s20 = sphi %s3645_s20, %s4744_s20   ;;  %s3479_s1 = sphi %s3643_s1, %s4743_s1   ;;  %s3475_s19 = sphi %s3641_s19, %s4742_s19   ;;  %s3471_s0 = sphi %s3639_s0, %s4741_s0   ;;  %s3467_s30 = sphi %s3637_s30, %s4740_s30   ;;  %s3463_s29 = sphi %s3635_s29, %s4739_s29   ;;  %s3459_s28 = sphi %s3633_s28, %s4738_s28   ;;  %s3455_s27 = sphi %s3631_s27, %s4737_s27  }
  0x21   : > { %4642 = sst [smem:[#allocation35_spill]] %s3463_s29  ;;  %s2343_s24 = sadd.s32 4294967294, %s3495_s2  }
  0x22   : > { %4643 = sst [smem:[#allocation36_spill]] %s3467_s30  ;;  %s46_s25 = sadd.s32 1, %s3487_s21 }
  0x23   : > { %4644 = sst [smem:[#allocation37_spill]] %s3471_s0  ;;  %s49_s26 = sadd.s32 1, %s3491_s22 }
  0x24   : > { %4645 = sst [smem:[#allocation38_spill]] %s3475_s19  ;;  %p47_p0 = scmp.ge.s32.totalorder %s46_s25, 2 }
  0x25   : > { %4646 = sst [smem:[#allocation39_spill]] %s3479_s1  ;;  %s56_s18 = sadd.s32 1, %s3475_s19 }
  0x26   : > { %4647 = sst [smem:[#allocation40_spill]] %s3483_s20  ;;  %p63_p1 = scmp.ne.s32.totalorder %s3475_s19, %s3471_s0 }
  0x27   : > { %4648 = sst [smem:[#allocation41_spill]] %s3487_s21  ;;  %p64_p2 = scmp.eq.s32.totalorder %s3495_s2, 0 }
  0x28   : > { %4649 = sst [smem:[#allocation42_spill]] %s3491_s22  ;;  %s4748_s25 = smov (%p47_p0, %s46_s25), 0 }
  0x29   : > { %4650 = sst [smem:[#allocation43_spill]] %s3687_s23  ;;  %s4750_s26 = smov (!%p47_p0, %s49_s26), %s3491_s22 }
  0x2a   : > { %4651 = sst [smem:[#allocation44_spill]] %s4748_s25  ;;  %p3704_p3 = por %p64_p2, %p63_p1 }
  0x2b   : > { %p69_p4 = scmp.ne.s32.totalorder %s3471_s0, %s3467_s30  ;;  %p51_p5 = scmp.ge.s32.totalorder %s4750_s26, 2 }
  0x2c   : > { %p4589_p6 = scmp.eq.s32.totalorder %s3687_s23, 0  ;;  %s100_s1 = ssub.s32 %s3487_s21, %s4748_s25 }
  0x2d   : > { %s103_s17 = sadd.s32 1, %s3463_s29  ;;  %s4752_s26 = smov (%p51_p5, %s4750_s26), 0 }
  0x2e   : > { %4653 = sst [smem:[#allocation45_spill]] %s4752_s26  ;;  %p3721_p7 = por %p4589_p6, %p69_p4 }
  0x2f   : > { %p101_p8 = scmp.eq.s32.totalorder %s100_s1, 0  ;;  %s53_s16 = ssub.s32 %s3491_s22, %s4752_s26 }
  0x30   : > { %s4654_s13 = scalar_select %p3721_p7, 1, 0 }
  0x31   : > { %p110_p9 = scmp.ne.s32.totalorder %s3463_s29, %s3459_s28  ;;  %p54_p10 = scmp.eq.s32.totalorder %s53_s16, 0 }
  0x32   : > { %4655 = sst [smem:[#allocation46_spill]] %s4654_s13  ;;  %p116_p11 = scmp.ne.s32.totalorder %s3459_s28, %s3455_s27 }
  0x33   : > { %s3732_s25 = scalar_select %p101_p8, %s3463_s29, %s103_s17  }
  0x34   : > { %s3735_s14 = scalar_select %p54_p10, %s3475_s19, %s56_s18  }
  0x35   : > { %4656 = sst [smem:[#allocation47_spill]] %s3732_s25  ;;  %p3739_p12 = por %p110_p9, %p64_p2 }
  0x36   : > { %4657 = sst [smem:[#allocation48_spill]] %s3735_s14  ;;  %p3745_p13 = por %p116_p11, %p4589_p6 }
  0x37   : > { %p510_p0 = scmp.eq.s32.totalorder %s3687_s23, 3  ;;  %p516_p5 = scmp.eq.s32.totalorder %s2343_s24, 3 }
  0x38   : > { %s4659_s13 = scalar_select %p3745_p13, 1, 0 }
  0x39   : > { %p3753_p8 = por %p510_p0, %p63_p1  ;;  %p3760_p10 = por %p516_p5, %p69_p4 }
  0x3a   : > { %4660 = sst [smem:[#allocation49_spill]] %s4659_s13  ;;  %p2669_p2 = scmp.lt.s32.totalorder %s3495_s2, 4 }
  0x3b   : > { %s4661_s16 = scalar_select %p3753_p8, 1, 0 }
  0x3c   : > { %s4663_s17 = scalar_select %p3760_p10, 1, 0 }
  0x3d   : > { %4662 = sst [smem:[#allocation50_spill]] %s4661_s16  ;;  %s593_s18 = sand.u32 1, %s3495_s2  }
  0x3e   : > { %4664 = sst [smem:[#allocation51_spill]] %s4663_s17  ;;  %s595_s27 = sand.u32 1, %s3475_s19  }
  0x3f   : > { %s2351_s1 = sshll.u32 %s595_s27, 3  ;;  %s2352_s26 = sshll.u32 %s3491_s22, 7 }
  0x40   : > { %s4665_s13 = sld [smem:[#allocation52_spill]]  ;;  %s597_s24 = scalar_lea.vmem [#allocation3], %s2351_s1 }
  0x41   : > { %s604_s30 = sshll.u32 %s597_s24, 4  ;;  %p3775_p1 = pnand %p2669_p2, %p3704_p3  ;;  %s3779_s30 = int_to_ptr.vmem [resolvable:$true] %s604_s30 }
  0x42   : > { %s3782_s27 = sand.u32 1, %s3463_s29   ;;  %p3786_p4 = pnand %p2669_p2, %p3739_p12 }
  0x43   : > { %s3790_s25 = scalar_lea.sflag [#allocation4], %s593_s18  ;;  %p2825_p3 = pneg %p3775_p1 }
  0x44   : > { %s4667_s14 = scalar_select %p3786_p4, 1, 0 }
  0x46   : > { %s3771_s28 = scalar_lea.hbm %s4665_s13, %s2352_s26  ;;  %s2828_s24 = scalar_lea.hbm %s4665_s13, 256 }
  0x47   : > { %s2823_s26 = scalar_lea.hbm %s3771_s28, 128  ;;  %p2829_p12 = scmp.lt.u32.totalorder %s3771_s28, %s4665_s13 }
  0x48   : > { %p2824_p9 = scmp.ne.s32.totalorder %s3771_s28, %s2823_s26  ;;  %p2830_p5 = scmp.lt.u32.totalorder %s2828_s24, %s2823_s26 }
  0x49   : > { %p2832_p6 = scmp.lt.u32.totalorder %s2823_s26, %s3771_s28 }
  0x4a   : > { %p2826_p11 = pnand %p2825_p3, %p2824_p9  ;;  %p2831_p2 = por %p2830_p5, %p2829_p12 }
  0x4c   : > { %p2827_p0 = pneg %p2826_p11  ;;  %p2833_p10 = por %p2832_p6, %p2831_p2 }
  0x4e   : > { %p2834_p8 = pnand %p2833_p10, %p2827_p0 }
  0x50   : > { %2837 = shalt.err (!%p2834_p8)
}
  0x51   : > { %s2838_s18 = scalar_lea.vmem %s3779_s30, 128  ;;  %s3497_s20 = smov [#allocation3]  }
  0x52   : > { %p2839_p9 = scmp.ne.s32.totalorder %s3779_s30, %s2838_s18  ;;  %s2843_s1 = sshll.u32 %s3497_s20, 4  ;;  %s2844_s1 = int_to_ptr.vmem [resolvable:$false] %s2843_s1 }
  0x53   : > { %s2845_s22 = scalar_lea.vmem %s2844_s1, 256  ;;  %p2846_p7 = scmp.lt.s32.totalorder %s3779_s30, %s2844_s1 }
  0x54   : > { %p2841_p11 = pnand %p2839_p9, %p2825_p3  ;;  %p2847_p12 = scmp.lt.s32.totalorder %s2845_s22, %s2838_s18 }
  0x56   : > { %p2842_p13 = pneg %p2841_p11  ;;  %p2848_p5 = por %p2847_p12, %p2846_p7 }
  0x58   : > { %p2849_p6 = pnand %p2848_p5, %p2842_p13 }
  0x5a   : > { %2852 = shalt.err (!%p2849_p6)
}
  0x5b   : > { %2623 = dma.hbm_to_vmem [thread:$0]  (!%p3775_p1), %s3771_s28, 128, %s3779_s30, %s3790_s25  }
  0x5c   : > { %s3819_s26 = sshll.u32 %s3782_s27, 4  ;;  %s3822_s24 = sshll.u32 %s3487_s21, 8 }
  0x5d   : > { %s4668_s20 = sld [smem:[#allocation54_spill]]  ;;  %s615_s16 = scalar_lea.vmem [#allocation8], %s3819_s26 }
  0x5e   : > { %s622_s22 = sshll.u32 %s615_s16, 4  ;;  %p3837_p13 = pneg %p3786_p4  ;;  %s3831_s22 = int_to_ptr.vmem [resolvable:$true] %s622_s22 }
  0x60   : > { %s4670_s30 = scalar_select %p3837_p13, 1, 0 }
  0x63   : > { %s4669_s13 = smov %s4668_s20  ;;  %s3828_s1 = scalar_lea.hbm %s4668_s20, %s3822_s24 }
  0x64   : > { %s2853_s28 = scalar_lea.hbm %s3828_s1, 256  ;;  %s2858_s20 = scalar_lea.hbm %s4669_s13, 512 }
  0x65   : > { %p2854_p7 = scmp.ne.s32.totalorder %s3828_s1, %s2853_s28  ;;  %p2859_p1 = scmp.lt.u32.totalorder %s3828_s1, %s4669_s13 }
  0x66   : > { %p2860_p3 = scmp.lt.u32.totalorder %s2858_s20, %s2853_s28  ;;  %p2862_p2 = scmp.lt.u32.totalorder %s2853_s28, %s3828_s1 }
  0x67   : > { %p2856_p8 = pnand %p3837_p13, %p2854_p7 }
  0x68   : > { %p2861_p0 = por %p2860_p3, %p2859_p1 }
  0x69   : > { %p2857_p10 = pneg %p2856_p8 }
  0x6a   : > { %p2863_p9 = por %p2862_p2, %p2861_p0 }
  0x6c   : > { %p2864_p11 = pnand %p2863_p9, %p2857_p10 }
  0x6e   : > { %2867 = shalt.err (!%p2864_p11)
}
  0x6f   : > { %s2868_s16 = scalar_lea.vmem %s3831_s22, 256  ;;  %s3498_s15 = smov [#allocation8]  }
  0x70   : > { %p2869_p12 = scmp.ne.s32.totalorder %s3831_s22, %s2868_s16  ;;  %s2873_s18 = sshll.u32 %s3498_s15, 4  ;;  %s2874_s18 = int_to_ptr.vmem [resolvable:$false] %s2873_s18 }
  0x71   : > { %s2875_s29 = scalar_lea.vmem %s2874_s18, 512  ;;  %p2876_p7 = scmp.lt.s32.totalorder %s3831_s22, %s2874_s18 }
  0x72   : > { %p2871_p5 = pnand %p2869_p12, %p3837_p13  ;;  %p2877_p8 = scmp.lt.s32.totalorder %s2875_s29, %s2868_s16 }
  0x74   : > { %p2872_p6 = pneg %p2871_p5  ;;  %p2878_p1 = por %p2877_p8, %p2876_p7 }
  0x76   : > { %p2879_p3 = pnand %p2878_p1, %p2872_p6 }
  0x78   : > { %2882 = shalt.err (!%p2879_p3)
}
  0x79   : > { %s4605_s19 = smov 64   ;;  %s4610_s28 = smov 4  }
  0x7a   : > { %2626 = dma.hbm_to_vmem [thread:$0]  (!%p3786_p4), %s3828_s1, 256, %s3831_s22, %s3790_s25, %s4605_s19, %s4605_s19, %s4610_s28  }
  0x7b   : > { %s3865_s20 = sshll.u32 %s3487_s21, 4  ;;  %s635_s16 = scalar_lea.vmem [#allocation9], %s3782_s27 }
  0x7c   : > { %s642_s15 = sshll.u32 %s635_s16, 4  ;;  %s4671_s3 = sld [smem:[#allocation55_spill]]  ;;  %s643_s15 = int_to_ptr.vmem [resolvable:$true] %s642_s15 }
  0x82   : > { %s640_s13 = scalar_lea.hbm %s4671_s3, %s3865_s20  ;;  %s2888_s23 = scalar_lea.hbm %s4671_s3, 32 }
  0x83   : > { %s2883_s17 = scalar_lea.hbm %s640_s13, 16  ;;  %p2889_p9 = scmp.lt.u32.totalorder %s640_s13, %s4671_s3 }
  0x84   : > { %p2884_p10 = scmp.ne.s32.totalorder %s640_s13, %s2883_s17  ;;  %p2890_p11 = scmp.lt.u32.totalorder %s2888_s23, %s2883_s17 }
  0x85   : > { %p2892_p5 = scmp.lt.u32.totalorder %s2883_s17, %s640_s13 }
  0x86   : > { %p2886_p0 = pnand %p2884_p10, %p3837_p13  ;;  %p2891_p12 = por %p2890_p11, %p2889_p9 }
  0x88   : > { %p2887_p2 = pneg %p2886_p0  ;;  %p2893_p6 = por %p2892_p5, %p2891_p12 }
  0x8a   : > { %p2894_p7 = pnand %p2893_p6, %p2887_p2 }
  0x8c   : > { %2897 = shalt.err (!%p2894_p7)
}
  0x8d   : > { %s2898_s16 = scalar_lea.vmem %s643_s15, 16  ;;  %s3501_s18 = smov [#allocation9]  }
  0x8e   : > { %p2899_p8 = scmp.ne.s32.totalorder %s643_s15, %s2898_s16  ;;  %s2903_s29 = sshll.u32 %s3501_s18, 4  ;;  %s2904_s29 = int_to_ptr.vmem [resolvable:$false] %s2903_s29 }
  0x8f   : > { %s2905_s12 = scalar_lea.vmem %s2904_s29, 32  ;;  %p2906_p10 = scmp.lt.s32.totalorder %s643_s15, %s2904_s29 }
  0x90   : > { %p2901_p1 = pnand %p2899_p8, %p3837_p13  ;;  %p2907_p0 = scmp.lt.s32.totalorder %s2905_s12, %s2898_s16 }
  0x92   : > { %p2902_p3 = pneg %p2901_p1  ;;  %p2908_p4 = por %p2907_p0, %p2906_p10 }
  0x94   : > { %p2909_p9 = pnand %p2908_p4, %p2902_p3 }
  0x96   : > { %2912 = shalt.err (!%p2909_p9)
}
  0x97   : > { %p4672_p11 = scmp.ne.s32.totalorder %s4667_s14, 0  ;;  %s4673_s4 = sld [smem:[#allocation56_spill]] }
  0x98   : > { %s653_s1 = scalar_lea.vmem [#allocation10], %s3819_s26  ;;  %s4674_s5 = sld [smem:[#allocation57_spill]] }
  0x99   : > { %2629 = dma.hbm_to_vmem [thread:$0]  (!%p4672_p11), %s640_s13, 16, %s643_s15, %s3790_s25  }
  0x9a   : > { %s660_s22 = sshll.u32 %s653_s1, 4  ;;  %s3892_s22 = int_to_ptr.vmem [resolvable:$true] %s660_s22 }
  0x9d   : > { %s3889_s17 = scalar_lea.hbm %s4673_s4, %s3822_s24  ;;  %s2918_s0 = scalar_lea.hbm %s4673_s4, 512 }
  0x9e   : > { %s3898_s29 = scalar_lea.hbm %s4674_s5, %s3865_s20  ;;  %s2913_s12 = scalar_lea.hbm %s3889_s17, 256 }
  0x9f   : > { %p2914_p4 = scmp.ne.s32.totalorder %s3889_s17, %s2913_s12  ;;  %p2919_p5 = scmp.lt.u32.totalorder %s3889_s17, %s4673_s4 }
  0xa0   : > { %p2920_p6 = scmp.lt.u32.totalorder %s2918_s0, %s2913_s12  ;;  %p2922_p8 = scmp.lt.u32.totalorder %s2913_s12, %s3889_s17 }
  0xa1   : > { %p2916_p2 = pnand %p2914_p4, %p3837_p13 }
  0xa2   : > { %p2921_p7 = por %p2920_p6, %p2919_p5 }
  0xa3   : > { %p2917_p12 = pneg %p2916_p2 }
  0xa4   : > { %p2923_p1 = por %p2922_p8, %p2921_p7 }
  0xa6   : > { %p2924_p3 = pnand %p2923_p1, %p2917_p12 }
  0xa8   : > { %2927 = shalt.err (!%p2924_p3)
}
  0xa9   : > { %s2928_s1 = scalar_lea.vmem %s3892_s22, 256  ;;  %s3502_s16 = smov [#allocation10]  }
  0xaa   : > { %p2929_p10 = scmp.ne.s32.totalorder %s3892_s22, %s2928_s1  ;;  %s2933_s18 = sshll.u32 %s3502_s16, 4  ;;  %s2934_s18 = int_to_ptr.vmem [resolvable:$false] %s2933_s18 }
  0xab   : > { %s2935_s19 = scalar_lea.vmem %s2934_s18, 512  ;;  %p2936_p4 = scmp.lt.s32.totalorder %s3892_s22, %s2934_s18 }
  0xac   : > { %p2931_p0 = pnand %p2929_p10, %p3837_p13  ;;  %p2937_p2 = scmp.lt.s32.totalorder %s2935_s19, %s2928_s1 }
  0xae   : > { %p2932_p9 = pneg %p2931_p0  ;;  %p2938_p5 = por %p2937_p2, %p2936_p4 }
  0xb0   : > { %p2939_p6 = pnand %p2938_p5, %p2932_p9 }
  0xb2   : > { %2942 = shalt.err (!%p2939_p6)
}
  0xb3   : > { %s4675_s12 = smov 64   ;;  %s673_s13 = scalar_lea.vmem [#allocation11], %s3782_s27 }
  0xb4   : > { %2632 = dma.hbm_to_vmem [thread:$0]  (!%p4672_p11), %s3889_s17, 256, %s3892_s22, %s3790_s25, %s4675_s12, %s4675_s12, %s4610_s28  }
  0xb5   : > { %s680_s15 = sshll.u32 %s673_s13, 4  ;;  %s4676_s6 = sld [smem:[#allocation58_spill]]  ;;  %s681_s15 = int_to_ptr.vmem [resolvable:$true] %s680_s15 }
  0xb6   : > { %s2943_s16 = scalar_lea.hbm %s3898_s29, 16  ;;  %s2948_s3 = scalar_lea.hbm %s4674_s5, 32 }
  0xb7   : > { %p2944_p12 = scmp.ne.s32.totalorder %s3898_s29, %s2943_s16  ;;  %p2949_p1 = scmp.lt.u32.totalorder %s3898_s29, %s4674_s5 }
  0xb8   : > { %p2950_p3 = scmp.lt.u32.totalorder %s2948_s3, %s2943_s16  ;;  %p2952_p0 = scmp.lt.u32.totalorder %s2943_s16, %s3898_s29 }
  0xb9   : > { %p2946_p7 = pnand %p2944_p12, %p3837_p13 }
  0xba   : > { %p2951_p10 = por %p2950_p3, %p2949_p1 }
  0xbb   : > { %s3930_s1 = scalar_lea.hbm %s4676_s6, %s3865_s20  ;;  %p2947_p8 = pneg %p2946_p7 }
  0xbc   : > { %p2953_p9 = por %p2952_p0, %p2951_p10 }
  0xbe   : > { %p2954_p4 = pnand %p2953_p9, %p2947_p8 }
  0xc0   : > { %2957 = shalt.err (!%p2954_p4)
}
  0xc1   : > { %s2958_s17 = scalar_lea.vmem %s681_s15, 16  ;;  %s3503_s22 = smov [#allocation11]  }
  0xc2   : > { %p2959_p2 = scmp.ne.s32.totalorder %s681_s15, %s2958_s17  ;;  %s2963_s13 = sshll.u32 %s3503_s22, 4  ;;  %s2964_s13 = int_to_ptr.vmem [resolvable:$false] %s2963_s13 }
  0xc3   : > { %s2965_s0 = scalar_lea.vmem %s2964_s13, 32  ;;  %p2966_p12 = scmp.lt.s32.totalorder %s681_s15, %s2964_s13 }
  0xc4   : > { %p2961_p5 = pnand %p2959_p2, %p3837_p13  ;;  %p2967_p7 = scmp.lt.s32.totalorder %s2965_s0, %s2958_s17 }
  0xc6   : > { %p2962_p6 = pneg %p2961_p5  ;;  %p2968_p11 = por %p2967_p7, %p2966_p12 }
  0xc8   : > { %p2969_p1 = pnand %p2968_p11, %p2962_p6 }
  0xca   : > { %2972 = shalt.err (!%p2969_p1)
}
  0xcb   : > { %p4677_p3 = scmp.ne.s32.totalorder %s4667_s14, 0  ;;  %s690_s3 = scalar_lea.vmem [#allocation12], %s3782_s27 }
  0xcc   : > { %s697_s4 = sshll.u32 %s690_s3, 4  ;;  %s4678_s7 = sld [smem:[#allocation59_spill]]  ;;  %s698_s4 = int_to_ptr.vmem [resolvable:$true] %s697_s4 }
  0xcd   : > { %2635 = dma.hbm_to_vmem [thread:$0]  (!%p4677_p3), %s3898_s29, 16, %s681_s15, %s3790_s25  }
  0xce   : > { %s2973_s18 = scalar_lea.hbm %s3930_s1, 16  ;;  %s2978_s22 = scalar_lea.hbm %s4676_s6, 32 }
  0xcf   : > { %p2974_p11 = scmp.ne.s32.totalorder %s3930_s1, %s2973_s18  ;;  %p2979_p0 = scmp.lt.u32.totalorder %s3930_s1, %s4676_s6 }
  0xd0   : > { %p2980_p9 = scmp.lt.u32.totalorder %s2978_s22, %s2973_s18  ;;  %p2982_p2 = scmp.lt.u32.totalorder %s2973_s18, %s3930_s1 }
  0xd1   : > { %p2976_p8 = pnand %p2974_p11, %p3837_p13 }
  0xd2   : > { %s3955_s16 = scalar_lea.hbm %s4678_s7, %s3865_s20  ;;  %p2981_p4 = por %p2980_p9, %p2979_p0 }
  0xd3   : > { %p2977_p10 = pneg %p2976_p8 }
  0xd4   : > { %p2983_p5 = por %p2982_p2, %p2981_p4 }
  0xd6   : > { %p2984_p6 = pnand %p2983_p5, %p2977_p10 }
  0xd8   : > { %2987 = shalt.err (!%p2984_p6)
}
  0xd9   : > { %s2988_s29 = scalar_lea.vmem %s698_s4, 16  ;;  %s3504_s15 = smov [#allocation12]  }
  0xda   : > { %p2989_p12 = scmp.ne.s32.totalorder %s698_s4, %s2988_s29  ;;  %s2993_s3 = sshll.u32 %s3504_s15, 4  ;;  %s2994_s3 = int_to_ptr.vmem [resolvable:$false] %s2993_s3 }
  0xdb   : > { %s2995_s21 = scalar_lea.vmem %s2994_s3, 32  ;;  %p2996_p11 = scmp.lt.s32.totalorder %s698_s4, %s2994_s3 }
  0xdc   : > { %p2991_p7 = pnand %p2989_p12, %p3837_p13  ;;  %p2997_p8 = scmp.lt.s32.totalorder %s2995_s21, %s2988_s29 }
  0xde   : > { %p2992_p1 = pneg %p2991_p7  ;;  %p2998_p3 = por %p2997_p8, %p2996_p11 }
  0xe0   : > { %p2999_p0 = pnand %p2998_p3, %p2992_p1 }
  0xe2   : > { %3002 = shalt.err (!%p2999_p0)
}
  0xe3   : > { %p4679_p9 = scmp.ne.s32.totalorder %s4667_s14, 0  ;;  %s707_s23 = scalar_lea.vmem [#allocation13], %s3782_s27 }
  0xe4   : > { %s714_s18 = sshll.u32 %s707_s23, 4  ;;  %s4680_s8 = sld [smem:[#allocation60_spill]]  ;;  %s715_s18 = int_to_ptr.vmem [resolvable:$true] %s714_s18 }
  0xe5   : > { %2638 = dma.hbm_to_vmem [thread:$0]  (!%p4679_p9), %s3930_s1, 16, %s698_s4, %s3790_s25  }
  0xe6   : > { %s3003_s13 = scalar_lea.hbm %s3955_s16, 16  ;;  %s3008_s15 = scalar_lea.hbm %s4678_s7, 32 }
  0xe7   : > { %p3004_p3 = scmp.ne.s32.totalorder %s3955_s16, %s3003_s13  ;;  %p3009_p2 = scmp.lt.u32.totalorder %s3955_s16, %s4678_s7 }
  0xe8   : > { %p3010_p5 = scmp.lt.u32.totalorder %s3008_s15, %s3003_s13  ;;  %p3012_p12 = scmp.lt.u32.totalorder %s3003_s13, %s3955_s16 }
  0xe9   : > { %p3006_p10 = pnand %p3004_p3, %p3837_p13 }
  0xea   : > { %s3980_s22 = scalar_lea.hbm %s4680_s8, %s3865_s20  ;;  %p3011_p6 = por %p3010_p5, %p3009_p2 }
  0xeb   : > { %p3007_p4 = pneg %p3006_p10 }
  0xec   : > { %p3013_p7 = por %p3012_p12, %p3011_p6 }
  0xee   : > { %p3014_p1 = pnand %p3013_p7, %p3007_p4 }
  0xf0   : > { %3017 = shalt.err (!%p3014_p1)
}
  0xf1   : > { %s3018_s1 = scalar_lea.vmem %s715_s18, 16  ;;  %s3505_s4 = smov [#allocation13]  }
  0xf2   : > { %p3019_p11 = scmp.ne.s32.totalorder %s715_s18, %s3018_s1  ;;  %s3023_s23 = sshll.u32 %s3505_s4, 4  ;;  %s3024_s23 = int_to_ptr.vmem [resolvable:$false] %s3023_s23 }
  0xf3   : > { %s3025_s19 = scalar_lea.vmem %s3024_s23, 32  ;;  %p3026_p3 = scmp.lt.s32.totalorder %s715_s18, %s3024_s23 }
  0xf4   : > { %p3021_p8 = pnand %p3019_p11, %p3837_p13  ;;  %p3027_p10 = scmp.lt.s32.totalorder %s3025_s19, %s3018_s1 }
  0xf6   : > { %p3022_p0 = pneg %p3021_p8  ;;  %p3028_p9 = por %p3027_p10, %p3026_p3 }
  0xf8   : > { %p3029_p2 = pnand %p3028_p9, %p3022_p0 }
  0xfa   : > { %3032 = shalt.err (!%p3029_p2)
}
  0xfb   : > { %p4681_p5 = scmp.ne.s32.totalorder %s4667_s14, 0  ;;  %s724_s17 = scalar_lea.vmem [#allocation14], %s3782_s27 }
  0xfc   : > { %s731_s13 = sshll.u32 %s724_s17, 4  ;;  %s4682_s9 = sld [smem:[#allocation61_spill]]  ;;  %s732_s13 = int_to_ptr.vmem [resolvable:$true] %s731_s13 }
  0xfd   : > { %2641 = dma.hbm_to_vmem [thread:$0]  (!%p4681_p5), %s3955_s16, 16, %s715_s18, %s3790_s25  }
  0xfe   : > { %s3033_s3 = scalar_lea.hbm %s3980_s22, 16  ;;  %s3038_s4 = scalar_lea.hbm %s4680_s8, 32 }
  0xff   : > { %p3034_p9 = scmp.ne.s32.totalorder %s3980_s22, %s3033_s3  ;;  %p3039_p12 = scmp.lt.u32.totalorder %s3980_s22, %s4680_s8 }
 0x100   : > { %p3040_p7 = scmp.lt.u32.totalorder %s3038_s4, %s3033_s3  ;;  %p3042_p11 = scmp.lt.u32.totalorder %s3033_s3, %s3980_s22 }
 0x101   : > { %p3036_p4 = pnand %p3034_p9, %p3837_p13 }
 0x102   : > { %s4005_s15 = scalar_lea.hbm %s4682_s9, %s3865_s20  ;;  %p3041_p1 = por %p3040_p7, %p3039_p12 }
 0x103   : > { %p3037_p6 = pneg %p3036_p4 }
 0x104   : > { %p3043_p8 = por %p3042_p11, %p3041_p1 }
 0x106   : > { %p3044_p0 = pnand %p3043_p8, %p3037_p6 }
 0x108   : > { %3047 = shalt.err (!%p3044_p0)
}
 0x109   : > { %s3048_s16 = scalar_lea.vmem %s732_s13, 16  ;;  %s3506_s18 = smov [#allocation14]  }
 0x10a   : > { %p3049_p3 = scmp.ne.s32.totalorder %s732_s13, %s3048_s16  ;;  %s3053_s17 = sshll.u32 %s3506_s18, 4  ;;  %s3054_s17 = int_to_ptr.vmem [resolvable:$false] %s3053_s17 }
 0x10b   : > { %s3055_s0 = scalar_lea.vmem %s3054_s17, 32  ;;  %p3056_p9 = scmp.lt.s32.totalorder %s732_s13, %s3054_s17 }
 0x10c   : > { %p3051_p10 = pnand %p3049_p3, %p3837_p13  ;;  %p3057_p4 = scmp.lt.s32.totalorder %s3055_s0, %s3048_s16 }
 0x10e   : > { %p3052_p2 = pneg %p3051_p10  ;;  %p3058_p5 = por %p3057_p4, %p3056_p9 }
 0x110   : > { %p3059_p7 = pnand %p3058_p5, %p3052_p2 }
 0x112   : > { %3062 = shalt.err (!%p3059_p7)
}
 0x113   : > { %p4683_p12 = scmp.ne.s32.totalorder %s4667_s14, 0  ;;  %s741_s29 = scalar_lea.vmem [#allocation15], %s3782_s27 }
 0x114   : > { %s748_s3 = sshll.u32 %s741_s29, 4  ;;  %s4684_s10 = sld [smem:[#allocation62_spill]]  ;;  %s749_s3 = int_to_ptr.vmem [resolvable:$true] %s748_s3 }
 0x115   : > { %2644 = dma.hbm_to_vmem [thread:$0]  (!%p4683_p12), %s3980_s22, 16, %s732_s13, %s3790_s25  }
 0x116   : > { %s3063_s23 = scalar_lea.hbm %s4005_s15, 16  ;;  %s3068_s18 = scalar_lea.hbm %s4682_s9, 32 }
 0x117   : > { %p3064_p5 = scmp.ne.s32.totalorder %s4005_s15, %s3063_s23  ;;  %p3069_p11 = scmp.lt.u32.totalorder %s4005_s15, %s4682_s9 }
 0x118   : > { %p3070_p8 = scmp.lt.u32.totalorder %s3068_s18, %s3063_s23  ;;  %p3072_p3 = scmp.lt.u32.totalorder %s3063_s23, %s4005_s15 }
 0x119   : > { %p3066_p6 = pnand %p3064_p5, %p3837_p13 }
 0x11a   : > { %s4030_s4 = scalar_lea.hbm %s4684_s10, %s3822_s24  ;;  %p3071_p0 = por %p3070_p8, %p3069_p11 }
 0x11b   : > { %p3067_p1 = pneg %p3066_p6 }
 0x11c   : > { %p3073_p10 = por %p3072_p3, %p3071_p0 }
 0x11e   : > { %p3074_p2 = pnand %p3073_p10, %p3067_p1 }
 0x120   : > { %3077 = shalt.err (!%p3074_p2)
}
 0x121   : > { %s3078_s24 = scalar_lea.vmem %s749_s3, 16  ;;  %s3507_s22 = smov [#allocation15]  }
 0x122   : > { %p3079_p9 = scmp.ne.s32.totalorder %s749_s3, %s3078_s24  ;;  %s3083_s13 = sshll.u32 %s3507_s22, 4  ;;  %s3084_s13 = int_to_ptr.vmem [resolvable:$false] %s3083_s13 }
 0x123   : > { %s3085_s29 = scalar_lea.vmem %s3084_s13, 32  ;;  %p3086_p5 = scmp.lt.s32.totalorder %s749_s3, %s3084_s13 }
 0x124   : > { %p3081_p4 = pnand %p3079_p9, %p3837_p13  ;;  %p3087_p6 = scmp.lt.s32.totalorder %s3085_s29, %s3078_s24 }
 0x126   : > { %p3082_p7 = pneg %p3081_p4  ;;  %p3088_p12 = por %p3087_p6, %p3086_p5 }
 0x128   : > { %p3089_p8 = pnand %p3088_p12, %p3082_p7 }
 0x12a   : > { %3092 = shalt.err (!%p3089_p8)
}
 0x12b   : > { %p4685_p11 = scmp.ne.s32.totalorder %s4667_s14, 0  ;;  %s759_s21 = scalar_lea.vmem [#allocation16], %s3819_s26 }
 0x12c   : > { %s766_s1 = sshll.u32 %s759_s21, 4  ;;  %s4686_s11 = sld [smem:[#allocation63_spill]]  ;;  %s4051_s1 = int_to_ptr.vmem [resolvable:$true] %s766_s1 }
 0x12d   : > { %2647 = dma.hbm_to_vmem [thread:$0]  (!%p4685_p11), %s4005_s15, 16, %s749_s3, %s3790_s25  }
 0x12e   : > { %s3093_s18 = scalar_lea.hbm %s4030_s4, 256  ;;  %s3098_s24 = scalar_lea.hbm %s4684_s10, 512 }
 0x12f   : > { %p3094_p12 = scmp.ne.s32.totalorder %s4030_s4, %s3093_s18  ;;  %p3099_p3 = scmp.lt.u32.totalorder %s4030_s4, %s4684_s10 }
 0x130   : > { %p3100_p10 = scmp.lt.u32.totalorder %s3098_s24, %s3093_s18  ;;  %p3102_p9 = scmp.lt.u32.totalorder %s3093_s18, %s4030_s4 }
 0x131   : > { %p3096_p1 = pnand %p3094_p12, %p3837_p13 }
 0x132   : > { %s4057_s16 = scalar_lea.hbm %s4686_s11, %s3865_s20  ;;  %p3101_p2 = por %p3100_p10, %p3099_p3 }
 0x133   : > { %p3097_p0 = pneg %p3096_p1 }
 0x134   : > { %p3103_p4 = por %p3102_p9, %p3101_p2 }
 0x136   : > { %p3104_p7 = pnand %p3103_p4, %p3097_p0 }
 0x138   : > { %3107 = shalt.err (!%p3104_p7)
}
 0x139   : > { %s3108_s26 = scalar_lea.vmem %s4051_s1, 256  ;;  %s3508_s3 = smov [#allocation16]  }
 0x13a   : > { %p3109_p5 = scmp.ne.s32.totalorder %s4051_s1, %s3108_s26  ;;  %s3113_s13 = sshll.u32 %s3508_s3, 4  ;;  %s3114_s13 = int_to_ptr.vmem [resolvable:$false] %s3113_s13 }
 0x13b   : > { %s3115_s29 = scalar_lea.vmem %s3114_s13, 512  ;;  %p3116_p12 = scmp.lt.s32.totalorder %s4051_s1, %s3114_s13 }
 0x13c   : > { %p3111_p6 = pnand %p3109_p5, %p3837_p13  ;;  %p3117_p1 = scmp.lt.s32.totalorder %s3115_s29, %s3108_s26 }
 0x13e   : > { %p3112_p8 = pneg %p3111_p6  ;;  %p3118_p3 = por %p3117_p1, %p3116_p12 }
 0x140   : > { %p3119_p10 = pnand %p3118_p3, %p3112_p8 }
 0x142   : > { %3122 = shalt.err (!%p3119_p10)
}
 0x143   : > { %2650 = dma.hbm_to_vmem [thread:$0]  (!%p4685_p11), %s4030_s4, 256, %s4051_s1, %s3790_s25, %s4675_s12, %s4675_s12, %s4610_s28  }
 0x144   : > { %s779_s21 = scalar_lea.vmem [#allocation17], %s3782_s27  ;;  %s3123_s19 = scalar_lea.hbm %s4057_s16, 16 }
 0x145   : > { %s786_s23 = sshll.u32 %s779_s21, 4  ;;  %p3124_p0 = scmp.ne.s32.totalorder %s4057_s16, %s3123_s19  ;;  %s787_s23 = int_to_ptr.vmem [resolvable:$true] %s786_s23 }
 0x146   : > { %s3128_s0 = scalar_lea.hbm %s4686_s11, 32  ;;  %p3129_p4 = scmp.lt.u32.totalorder %s4057_s16, %s4686_s11 }
 0x147   : > { %p3126_p2 = pnand %p3124_p0, %p3837_p13  ;;  %p3130_p7 = scmp.lt.u32.totalorder %s3128_s0, %s3123_s19 }
 0x148   : > { %p3132_p6 = scmp.lt.u32.totalorder %s3123_s19, %s4057_s16 }
 0x149   : > { %p3127_p9 = pneg %p3126_p2  ;;  %p3131_p5 = por %p3130_p7, %p3129_p4 }
 0x14b   : > { %p3133_p8 = por %p3132_p6, %p3131_p5 }
 0x14d   : > { %p3134_p12 = pnand %p3133_p8, %p3127_p9 }
 0x14f   : > { %3137 = shalt.err (!%p3134_p12)
}
 0x150   : > { %s3138_s4 = scalar_lea.vmem %s787_s23, 16  ;;  %s3509_s1 = smov [#allocation17]  }
 0x151   : > { %p3139_p1 = scmp.ne.s32.totalorder %s787_s23, %s3138_s4  ;;  %s3143_s15 = sshll.u32 %s3509_s1, 4  ;;  %s3144_s15 = int_to_ptr.vmem [resolvable:$false] %s3143_s15 }
 0x152   : > { %s3145_s26 = scalar_lea.vmem %s3144_s15, 32  ;;  %p3146_p0 = scmp.lt.s32.totalorder %s787_s23, %s3144_s15 }
 0x153   : > { %p3141_p3 = pnand %p3139_p1, %p3837_p13  ;;  %p3147_p2 = scmp.lt.s32.totalorder %s3145_s26, %s3138_s4 }
 0x155   : > { %p3142_p10 = pneg %p3141_p3  ;;  %p3148_p11 = por %p3147_p2, %p3146_p0 }
 0x157   : > { %p3149_p4 = pnand %p3148_p11, %p3142_p10 }
 0x159   : > { %3152 = shalt.err (!%p3149_p4)
}
 0x15a   : > { %p4687_p7 = scmp.ne.s32.totalorder %s4667_s14, 0  ;;  %s4688_s3 = sld [smem:[#allocation41_spill]] }
 0x15b   : > { %s4689_s13 = sld [smem:[#allocation43_spill]]  ;;  %p2344_p9 = scmp.ge.s32.totalorder %s3495_s2, 1 }
 0x15c   : > { %2653 = dma.hbm_to_vmem [thread:$0]  (!%p4687_p7), %s4057_s16, 16, %s787_s23, %s3790_s25  }
 0x15d   : > { %p523_p5 = scmp.lt.s32.totalorder %s3495_s2, 5  ;;  %s3510_s21 = smov [#allocation6]  }
 0x15e   : > { %s536_s19 = sshll.u32 %s3510_s21, 4  ;;  %s3511_s18 = smov [#allocation21]   ;;  %s4109_s19 = int_to_ptr.vmem [resolvable:$true] %s536_s19 }
 0x15f   : > { %p4105_p6 = pnand %p2344_p9, %p523_p5  ;;  %s558_s17 = sshll.u32 %s3511_s18, 4  ;;  %s4113_s17 = int_to_ptr.vmem [resolvable:$true] %s558_s17 }
 0x160   : > { %s2369_s0 = sshll.u32 %s3782_s27, 5  ;;  %s2430_s24 = sshll.u32 %s4688_s3, 9 }
 0x161   : > { %s4690_s29 = scalar_select %p4105_p6, 1, 0 }
 0x162   : > { %p2604_p11 = pneg %p4105_p6  ;;  %p4691_p8 = scmp.eq.s32.totalorder %s4689_s13, 0 }
 0x163   : > { %s4693_s4 = sld [smem:[#allocation64_spill]]  ;;  %s797_s15 = scalar_lea.vmem [#allocation18], %s2369_s0 }
 0x164   : > { %p4119_p12 = pnand %p2604_p11, %p4691_p8  ;;  %s804_s26 = sshll.u32 %s797_s15, 4  ;;  %s4128_s26 = int_to_ptr.vmem [resolvable:$true] %s804_s26 }
 0x165   : > { %s4694_s28 = sld [smem:[#allocation53_spill]] }
 0x166   : > { %s4692_s16 = scalar_select %p4119_p12, 1, 0 }
 0x167   : > { %p4138_p3 = pneg %p4119_p12 }
 0x169   : > { %s4126_s1 = scalar_lea.hbm %s4693_s4, %s2430_s24 }
 0x16a   : > { %s4696_s7 = scalar_select %p4138_p3, 1, 0 }
 0x16b   : > { %s4695_s5 = smov %s4694_s28  ;;  %s3153_s6 = scalar_lea.hbm %s4694_s28, 128 }
 0x16c   : > { %p3154_p1 = scmp.ne.s32.totalorder %s4695_s5, %s3153_s6  ;;  %p3160_p2 = scmp.lt.u32.totalorder %s3153_s6, %s4695_s5 }
 0x16e   : > { %p3156_p10 = pnand %p4138_p3, %p3154_p1 }
 0x170   : > { %p3157_p0 = pneg %p3156_p10 }
 0x172   : > { %p3162_p4 = pnand %p3160_p2, %p3157_p0 }
 0x174   : > { %3165 = shalt.err (!%p3162_p4)
}
 0x175   : > { %s3166_s28 = scalar_lea.vmem %s4109_s19, 128  ;;  %p3174_p8 = scmp.lt.s32.totalorder %s4109_s19, %s4109_s19 }
 0x176   : > { %p3167_p9 = scmp.ne.s32.totalorder %s4109_s19, %s3166_s28  ;;  %p3175_p6 = scmp.lt.s32.totalorder %s3166_s28, %s3166_s28 }
 0x178   : > { %p3169_p5 = pnand %p3167_p9, %p4138_p3  ;;  %p3176_p1 = por %p3175_p6, %p3174_p8 }
 0x17a   : > { %p3170_p11 = pneg %p3169_p5 }
 0x17c   : > { %p3177_p10 = pnand %p3176_p1, %p3170_p11 }
 0x17e   : > { %3180 = shalt.err (!%p3177_p10)
}
 0x17f   : > { %2607 = dma.hbm_to_vmem [thread:$0]  (!%p4119_p12), %s4695_s5, 128, %s4109_s19, [#allocation7]  }
 0x180   : > { %s4697_s21 = sld [smem:[#allocation67_spill]] }
 0x186   : > { %s4698_s18 = smov %s4697_s21  ;;  %s3181_s3 = scalar_lea.hbm %s4697_s21, 16 }
 0x187   : > { %p3182_p0 = scmp.ne.s32.totalorder %s4698_s18, %s3181_s3  ;;  %p3188_p4 = scmp.lt.u32.totalorder %s3181_s3, %s4698_s18 }
 0x189   : > { %p3184_p6 = pnand %p3182_p0, %p4138_p3 }
 0x18b   : > { %p3185_p2 = pneg %p3184_p6 }
 0x18d   : > { %p3190_p9 = pnand %p3188_p4, %p3185_p2 }
 0x18f   : > { %3193 = shalt.err (!%p3190_p9)
}
 0x190   : > { %s3194_s19 = scalar_lea.vmem %s4113_s17, 16  ;;  %s3201_s6 = scalar_lea.vmem %s4113_s17, 32 }
 0x191   : > { %p3195_p5 = scmp.ne.s32.totalorder %s4113_s17, %s3194_s19  ;;  %p3202_p1 = scmp.lt.s32.totalorder %s4113_s17, %s4113_s17 }
 0x192   : > { %p3203_p10 = scmp.lt.s32.totalorder %s3201_s6, %s3194_s19 }
 0x193   : > { %p3197_p11 = pnand %p3195_p5, %p4138_p3 }
 0x194   : > { %p3204_p0 = por %p3203_p10, %p3202_p1 }
 0x195   : > { %p3198_p8 = pneg %p3197_p11 }
 0x197   : > { %p3205_p6 = pnand %p3204_p0, %p3198_p8 }
 0x199   : > { %3208 = shalt.err (!%p3205_p6)
}
 0x19a   : > { %2613 = dma.hbm_to_vmem [thread:$0]  (!%p4119_p12), %s4698_s18, 16, %s4113_s17, [#allocation22]  }
 0x19b   : > { %s3209_s15 = scalar_lea.hbm %s4126_s1, 512  ;;  %s3214_s13 = scalar_lea.hbm %s4693_s4, 1024 }
 0x19c   : > { %p3210_p2 = scmp.ne.s32.totalorder %s4126_s1, %s3209_s15  ;;  %p3215_p5 = scmp.lt.u32.totalorder %s4126_s1, %s4693_s4 }
 0x19d   : > { %p3216_p11 = scmp.lt.u32.totalorder %s3214_s13, %s3209_s15  ;;  %p3218_p1 = scmp.lt.u32.totalorder %s3209_s15, %s4126_s1 }
 0x19e   : > { %p3212_p4 = pnand %p3210_p2, %p3837_p13 }
 0x19f   : > { %p3217_p8 = por %p3216_p11, %p3215_p5 }
 0x1a0   : > { %p3213_p9 = pneg %p3212_p4 }
 0x1a1   : > { %p3219_p10 = por %p3218_p1, %p3217_p8 }
 0x1a3   : > { %p3220_p0 = pnand %p3219_p10, %p3213_p9 }
 0x1a5   : > { %3223 = shalt.err (!%p3220_p0)
}
 0x1a6   : > { %s3224_s17 = scalar_lea.vmem %s4128_s26, 512  ;;  %s3512_s28 = smov [#allocation18]  }
 0x1a7   : > { %p3225_p6 = scmp.ne.s32.totalorder %s4128_s26, %s3224_s17  ;;  %s3229_s19 = sshll.u32 %s3512_s28, 4  ;;  %s3230_s19 = int_to_ptr.vmem [resolvable:$false] %s3229_s19 }
 0x1a8   : > { %s3231_s6 = scalar_lea.vmem %s3230_s19, 1024  ;;  %p3232_p12 = scmp.lt.s32.totalorder %s4128_s26, %s3230_s19 }
 0x1a9   : > { %p3227_p2 = pnand %p3225_p6, %p3837_p13  ;;  %p3233_p3 = scmp.lt.s32.totalorder %s3231_s6, %s3224_s17 }
 0x1ab   : > { %p3228_p4 = pneg %p3227_p2  ;;  %p3234_p5 = por %p3233_p3, %p3232_p12 }
 0x1ad   : > { %p3235_p11 = pnand %p3234_p5, %p3228_p4 }
 0x1af   : > { %3238 = shalt.err (!%p3235_p11)
}
 0x1b0   : > { %s4699_s23 = smov 4   ;;  %s3513_s22 = smov [#allocation20]  }
 0x1b1   : > { %2656 = dma.hbm_to_vmem [thread:$0]  (!%p4687_p7), %s4126_s1, 512, %s4128_s26, %s3790_s25, %s4675_s12, %s4675_s12, %s4699_s23  }
 0x1b2   : > { %s547_s15 = sshll.u32 %s3513_s22, 4  ;;  %s3514_s21 = smov [#allocation23]   ;;  %s548_s15 = int_to_ptr.vmem [resolvable:$true] %s547_s15 }
 0x1b3   : > { %s568_s3 = sshll.u32 %s3514_s21, 4  ;;  %s4700_s24 = sld [smem:[#allocation66_spill]]  ;;  %s4208_s3 = int_to_ptr.vmem [resolvable:$true] %s568_s3 }
 0x1b4   : > { %p4701_p3 = scmp.ne.s32.totalorder %s4696_s7, 0 }
 0x1b9   : > { %s3239_s17 = scalar_lea.hbm %s4700_s24, 16 }
 0x1ba   : > { %p3240_p12 = scmp.ne.s32.totalorder %s4700_s24, %s3239_s17  ;;  %p3246_p1 = scmp.lt.u32.totalorder %s3239_s17, %s4700_s24 }
 0x1bc   : > { %p3242_p9 = pnand %p3240_p12, %p4701_p3 }
 0x1be   : > { %p3243_p8 = pneg %p3242_p9 }
 0x1c0   : > { %p3248_p10 = pnand %p3246_p1, %p3243_p8 }
 0x1c2   : > { %3251 = shalt.err (!%p3248_p10)
}
 0x1c3   : > { %s3252_s26 = scalar_lea.vmem %s548_s15, 16  ;;  %s3259_s22 = scalar_lea.vmem %s548_s15, 32 }
 0x1c4   : > { %p3253_p0 = scmp.ne.s32.totalorder %s548_s15, %s3252_s26  ;;  %p3260_p4 = scmp.lt.s32.totalorder %s548_s15, %s548_s15 }
 0x1c5   : > { %p3261_p5 = scmp.lt.s32.totalorder %s3259_s22, %s3252_s26 }
 0x1c6   : > { %p3255_p6 = pnand %p3253_p0, %p4701_p3 }
 0x1c7   : > { %p3262_p11 = por %p3261_p5, %p3260_p4 }
 0x1c8   : > { %p3256_p2 = pneg %p3255_p6 }
 0x1ca   : > { %p3263_p7 = pnand %p3262_p11, %p3256_p2 }
 0x1cc   : > { %3266 = shalt.err (!%p3263_p7)
}
 0x1cd   : > { %p4702_p12 = scmp.ne.s32.totalorder %s4692_s16, 0  ;;  %s4703_s28 = sld [smem:[#allocation68_spill]] }
 0x1cf   : > { %2610 = dma.hbm_to_vmem [thread:$0]  (!%p4702_p12), %s4700_s24, 16, %s548_s15, [#allocation7]  }
 0x1d3   : > { %s4704_s6 = smov %s4703_s28  ;;  %s3267_s19 = scalar_lea.hbm %s4703_s28, 256 }
 0x1d4   : > { %p3268_p9 = scmp.ne.s32.totalorder %s4704_s6, %s3267_s19  ;;  %p3274_p7 = scmp.lt.u32.totalorder %s3267_s19, %s4704_s6 }
 0x1d6   : > { %p3270_p8 = pnand %p3268_p9, %p4701_p3 }
 0x1d8   : > { %p3271_p1 = pneg %p3270_p8 }
 0x1da   : > { %p3276_p10 = pnand %p3274_p7, %p3271_p1 }
 0x1dc   : > { %3279 = shalt.err (!%p3276_p10)
}
 0x1dd   : > { %s3280_s15 = scalar_lea.vmem %s4208_s3, 256  ;;  %p3288_p4 = scmp.lt.s32.totalorder %s4208_s3, %s4208_s3 }
 0x1de   : > { %p3281_p0 = scmp.ne.s32.totalorder %s4208_s3, %s3280_s15  ;;  %p3289_p5 = scmp.lt.s32.totalorder %s3280_s15, %s3280_s15 }
 0x1e0   : > { %p3283_p6 = pnand %p3281_p0, %p4701_p3  ;;  %p3290_p11 = por %p3289_p5, %p3288_p4 }
 0x1e2   : > { %p3284_p2 = pneg %p3283_p6 }
 0x1e4   : > { %p3291_p9 = pnand %p3290_p11, %p3284_p2 }
 0x1e6   : > { %3294 = shalt.err (!%p3291_p9)
}
 0x1e7   : > { %2616 = dma.hbm_to_vmem [thread:$0]  (!%p4702_p12), %s4704_s6, 256, %s4208_s3, [#allocation22], %s4675_s12, %s4675_s12, %s4699_s23  }
 0x1e8   : > { %s3515_s13 = smov [#allocation24]   ;;  %s4705_s19 = sld [smem:[#allocation65_spill]] }
 0x1e9   : > { %s582_s0 = sshll.u32 %s3515_s13, 4  ;;  %s817_s22 = scalar_lea.vmem [#allocation19], %s3782_s27  ;;  %s583_s0 = int_to_ptr.vmem [resolvable:$true] %s582_s0 }
 0x1ea   : > { %s824_s15 = sshll.u32 %s817_s22, 4  ;;  %s4707_s9 = sld [smem:[#allocation69_spill]]  ;;  %s825_s15 = int_to_ptr.vmem [resolvable:$true] %s824_s15 }
 0x1ee   : > { %s4706_s26 = smov %s4705_s19  ;;  %s4258_s1 = scalar_lea.hbm %s4705_s19, %s3865_s20 }
 0x1f0   : > { %s3295_s10 = scalar_lea.hbm %s4707_s9, 16 }
 0x1f1   : > { %p3296_p8 = scmp.ne.s32.totalorder %s4707_s9, %s3295_s10  ;;  %p3302_p10 = scmp.lt.u32.totalorder %s3295_s10, %s4707_s9 }
 0x1f3   : > { %p3298_p1 = pnand %p3296_p8, %p4701_p3 }
 0x1f5   : > { %p3299_p7 = pneg %p3298_p1 }
 0x1f7   : > { %p3304_p0 = pnand %p3302_p10, %p3299_p7 }
 0x1f9   : > { %3307 = shalt.err (!%p3304_p0)
}
 0x1fa   : > { %s3308_s20 = scalar_lea.vmem %s583_s0, 16  ;;  %s3315_s5 = scalar_lea.vmem %s583_s0, 32 }
 0x1fb   : > { %p3309_p6 = scmp.ne.s32.totalorder %s583_s0, %s3308_s20  ;;  %p3316_p5 = scmp.lt.s32.totalorder %s583_s0, %s583_s0 }
 0x1fc   : > { %p3317_p11 = scmp.lt.s32.totalorder %s3315_s5, %s3308_s20 }
 0x1fd   : > { %p3311_p2 = pnand %p3309_p6, %p4701_p3 }
 0x1fe   : > { %p3318_p9 = por %p3317_p11, %p3316_p5 }
 0x1ff   : > { %p3312_p4 = pneg %p3311_p2 }
 0x201   : > { %p3319_p13 = pnand %p3318_p9, %p3312_p4 }
 0x203   : > { %3322 = shalt.err (!%p3319_p13)
}
 0x204   : > { %2619 = dma.hbm_to_vmem [thread:$0]  (!%p4702_p12), %s4707_s9, 16, %s583_s0, [#allocation25]  }
 0x205   : > { %s3323_s7 = scalar_lea.hbm %s4258_s1, 16  ;;  %p4708_p8 = scmp.ne.s32.totalorder %s4670_s30, 0 }
 0x206   : > { %p3324_p3 = scmp.ne.s32.totalorder %s4258_s1, %s3323_s7  ;;  %s3328_s3 = scalar_lea.hbm %s4706_s26, 32 }
 0x207   : > { %p3329_p13 = scmp.lt.u32.totalorder %s4258_s1, %s4706_s26  ;;  %p3330_p10 = scmp.lt.u32.totalorder %s3328_s3, %s3323_s7 }
 0x208   : > { %p3326_p1 = pnand %p3324_p3, %p4708_p8  ;;  %p3332_p6 = scmp.lt.u32.totalorder %s3323_s7, %s4258_s1 }
 0x209   : > { %p3331_p0 = por %p3330_p10, %p3329_p13 }
 0x20a   : > { %p3327_p7 = pneg %p3326_p1 }
 0x20b   : > { %p3333_p2 = por %p3332_p6, %p3331_p0 }
 0x20d   : > { %p3334_p4 = pnand %p3333_p2, %p3327_p7 }
 0x20f   : > { %3337 = shalt.err (!%p3334_p4)
}
 0x210   : > { %s3338_s13 = scalar_lea.vmem %s825_s15, 16  ;;  %s3516_s0 = smov [#allocation19]  }
 0x211   : > { %p3339_p12 = scmp.ne.s32.totalorder %s825_s15, %s3338_s13  ;;  %s3343_s17 = sshll.u32 %s3516_s0, 4  ;;  %s3344_s17 = int_to_ptr.vmem [resolvable:$false] %s3343_s17 }
 0x212   : > { %s3345_s28 = scalar_lea.vmem %s3344_s17, 32  ;;  %p3346_p9 = scmp.lt.s32.totalorder %s825_s15, %s3344_s17 }
 0x213   : > { %p3341_p5 = pnand %p3339_p12, %p4708_p8  ;;  %p3347_p3 = scmp.lt.s32.totalorder %s3345_s28, %s3338_s13 }
 0x215   : > { %p3342_p11 = pneg %p3341_p5  ;;  %p3348_p1 = por %p3347_p3, %p3346_p9 }
 0x217   : > { %p3349_p10 = pnand %p3348_p1, %p3342_p11 }
 0x219   : > { %3352 = shalt.err (!%p3349_p10)
}
 0x21a   : > { %p4709_p13 = scmp.ne.s32.totalorder %s4667_s14, 0  ;;  %p4710_p7 = scmp.ne.s32.totalorder %s4690_s29, 0 }
 0x21b   : > { %s4711_s30 = sld [smem:[#allocation43_spill]] (!%p4710_p7)  ;;  %s4712_s19 = sld [smem:[#allocation37_spill]] (!%p4710_p7) }
 0x21c   : > { %2659 = dma.hbm_to_vmem [thread:$0]  (!%p4709_p13), %s4258_s1, 16, %s825_s15, %s3790_s25  }
 0x21d   : > { %833 = sbr.rel (%p4710_p7) target bundleno = 3698 (0xe72), region = 92  ;;  %s4713_s22 = sld [smem:[#allocation46_spill]] (!%p4710_p7) }
 0x221   : > { %s835_s4 = sand.u32 (!%p4710_p7), 1, %s4711_s30   ;;  %s837_s12 = sand.u32 (!%p4710_p7), 1, %s4712_s19  }
 0x222   : > { %s4303_s23 = sshll.u32 (!%p4710_p7), %s837_s12, 3  ;;  %s836_s20 = scalar_lea.sflag (!%p4710_p7), [#allocation4], %s835_s4 }
 0x223   : > { %s839_s5 = scalar_lea.vmem (!%p4710_p7), [#allocation3], %s4303_s23  ;;  %p4714_p8 = scmp.ne.s32.totalorder (!%p4710_p7), %s4713_s22, 0 }
 0x225   : > { %3426 = dma.done.wait (%p4714_p8), %s836_s20, 128  }
 0x226   : > { %3428 = vsyncadd (%p4714_p8), %s836_s20, 4294967168  ;;  %p4715_p0 = scmp.eq.s32.totalorder %s4711_s30, 0 }
 0x228   : > { %3430 = dma.done.wait (%p4715_p0), [#allocation7], 128   ;;  %p4716_p6 = pmov %p4715_p0 }
 0x229   : > { %s4717_s14 = sld [smem:[#allocation34_spill]]  ;;  %s4718_s25 = sld [smem:[#allocation49_spill]] }
 0x22a   : > { %3432 = vsyncadd (%p4716_p6), [#allocation7], 4294967168 }
 0x22f   : > { %s4315_s29 = sand.u32 1, %s4717_s14   ;;  %p4719_p2 = scmp.ne.s32.totalorder %s4718_s25, 0 }
 0x230   : > { %s4318_s1 = sshll.u32 %s4315_s29, 4 }
 0x231   : > { %s852_s15 = scalar_lea.vmem [#allocation8], %s4318_s1 }
 0x232   : > { %3434 = dma.done.wait (%p4719_p2), %s836_s20, 1408  }
 0x233   : > { %3436 = vsyncadd (%p4719_p2), %s836_s20, 4294965888  ;;  %s2379_s8 = sshll.u32 %s4315_s29, 5  ;;  %s860_s11 = scalar_lea.vmem [#allocation9], %s4315_s29 }
 0x234   : > { %s869_s7 = scalar_lea.vmem [#allocation10], %s4318_s1  ;;  %s877_s10 = scalar_lea.vmem [#allocation11], %s4315_s29 }
 0x235   : > { %s885_s27 = scalar_lea.vmem [#allocation12], %s4315_s29  ;;  %s893_s3 = scalar_lea.vmem [#allocation13], %s4315_s29 }
 0x236   : > { %s901_s16 = scalar_lea.vmem [#allocation14], %s4315_s29  ;;  %s909_s21 = scalar_lea.vmem [#allocation15], %s4315_s29 }
 0x237   : > { %s918_s13 = scalar_lea.vmem [#allocation16], %s4318_s1  ;;  %s926_s0 = scalar_lea.vmem [#allocation17], %s4315_s29 }
 0x238   : > { %s4335_s17 = scalar_lea.vmem [#allocation18], %s2379_s8  ;;  %s943_s28 = scalar_lea.vmem [#allocation19], %s4315_s29 }
 0x239   : > { %p4720_p4 = pmov %p4715_p0 }
 0x23a   : > { %p4721_p12 = pmov %p4715_p0 }
 0x23b   : > { %3438 = dma.done.wait (%p4720_p4), [#allocation7], 16  }
 0x23c   : > { %3440 = vsyncadd (%p4721_p12), [#allocation7], 4294967280  ;;  %p4722_p5 = pmov %p4715_p0 }
 0x23d   : > { %p4723_p11 = pmov %p4715_p0 }
 0x23e   : > { %3442 = dma.done.wait (%p4722_p5), [#allocation22], 272  }
 0x23f   : > { %3444 = vsyncadd (%p4723_p11), [#allocation22], 4294967024  ;;  %p4724_p9 = pmov %p4715_p0 }
 0x240   : > { %p4725_p3 = pmov %p4715_p0 }
 0x241   : > { %3446 = dma.done.wait (%p4724_p9), [#allocation25], 16  }
 0x242   : > { %3448 = vsyncadd (%p4725_p3), [#allocation25], 4294967280  ;;  %s1063_s19 = scalar_lea.vmem [#allocation26], %s4303_s23  ;;  %s4726_s22 = sld [smem:[#allocation39_spill]] }
 0x248   : > { %p2385_p1 = scmp.ne.s32.totalorder %s4726_s22, 0 }
 0x249   : > { %v1069_v0 = vld [vmem:[%s839_s5] sm:$0xff] (!%p2385_p1)  ;;  %vm1070_vm0 = vcmask (!%p2385_p1), 261120  }
 0x24a   : > { %1068 = sbr.rel (%p2385_p1) target bundleno = 593 (0x251), region = 168  ;;  %1071 = vst.msk [vmem:[#allocation2] sm:$0xff] (!%p2385_p1), %vm1070_vm0, %v1069_v0 }
 0x251 PF: > { %v2789_v1 = vld [vmem:[%s852_s15] sm:$0xff]   ;;  %v3517_v2 = vmov 0.0   ;;  %v2790_v3 = vld [vmem:[%s852_s15 + $0x8] sm:$0xff]   ;;  %vm3518_vm1 = vmmov 0   ;;  %vm1098_vm2 = vcmask 261120   ;;  %s3519_s30 = smov 120  }
 0x252   : > { %2464 = vmatprep.subr.bf16.mxu0 %v3517_v2  ;;  %2472 = vmatprep.subr.bf16.mxu1 %v3517_v2  ;;  %v4362_v4 = vld [vmem:[#allocation2] sm:$0xff]  ;;  %s3520_s4 = smov 96   ;;  %s3521_s20 = smov 80   ;;  %vm1146_vm3 = vcmask 64512   ;;  %v1074_v24 = vld [vmem:[#allocation6] sm:$0xff]  ;;  %vm1210_vm4 = vcmask 1043456  }
 0x253   : > { %2465 = vmatpush3.bf16.msra.mxu0 %v2789_v1  ;;  %2468 = vmatprep.mubr.msk.bf16.mxu0 %vm3518_vm1, %v3517_v2  ;;  %v1073_v5 = vpack.c.bf16 %v4362_v4, %v4362_v4  ;;  %v2386_v6 = vld [vmem:[%s860_s11] ss:$0 sm:$0xff]  ;;  %s3522_s5 = smov 88   ;;  %s3523_s14 = smov 72   ;;  %vm1597_vm5 = vcmask 130048   ;;  %vm1599_vm6 = vcmask 195584  }
 0x254   : > { %2466 = vmatprep.subr.bf16.mxu0 %v3517_v2  ;;  %2474 = vmatprep.mubr.msk.bf16.mxu1 %vm3518_vm1, %v3517_v2  ;;  %s3524_s25 = smov 112   ;;  %s3525_s15 = smov 104   ;;  %vm1807_vm7 = vcmask 523264  }
 0x255   : > { %s3526_s8 = smov 56   ;;  %s3527_s11 = smov 64  }
 0x256   : > { %s3528_s22 = smov 40   ;;  %s4727_s1 = sld [smem:[#allocation39_spill]] }
 0x257   : > { %2467 = vmatpush3.bf16.msra.mxu0 %v2790_v3 }
 0x258   : > { %2478 = vmatprep.subr.bf16.mxu0 %v3517_v2 }
 0x25a   : > { %2469 = vmatmul.mubr.msk.bf16.vlgmr.msra.gmra.mrb[0].mxu0 %vm1098_vm2, %v1073_v5 }
 0x25b   : > { %2480 = vmatprep.mubr.msk.bf16.mxu0 %vm3518_vm1, %v3517_v2 }
 0x25c   : > { %p2416_p10 = scmp.ne.s32.totalorder %s4727_s1, 1 }
 0x25d   : > { %vm3534_vm8 = vmmov (!%p2416_p10), 0  }
 0x32d   : > { %v1136_v7 = vpop.f32.mrb[0].mxu0 }
 0x32e   : > { %v1137_v8 = vadd.f32 %v2386_v6, %v1136_v7  ;;  %v2470_v9 = vpop.f32.mrb[1].mxu0 }
 0x32f   : > { %v1139_v10 = vpop.f32.mrb[2].mxu0 }
 0x330   : > { %v4375_v11 = vpack.c.bf16 %v1137_v8, %v1137_v8  ;;  %v2471_v12 = vpop.f32.mrb[3].mxu0 }
 0x332   : > { %1254 = vrot.lane.b32.xlu1 %v4375_v11, %s3519_s30  ;;  %1144 = vrot.lane.b32.xlu0 %v4375_v11, %s3520_s4  ;;  %s3529_s30 = smov 48   ;;  %s3530_s4 = smov 8  }
 0x336   : > { %1366 = vrot.lane.b32.xlu1 %v4375_v11, %s3521_s20  ;;  %1256 = vrot.lane.b32.xlu0 %v4375_v11, %s3522_s5  ;;  %s3531_s20 = smov 16   ;;  %s3532_s5 = smov 24  }
 0x33a   : > { %1476 = vrot.lane.b32.xlu1 %v4375_v11, %s3523_s14  ;;  %1364 = vrot.lane.b32.xlu0 %v4375_v11, %s3524_s25 }
 0x33e   : > { %1474 = vrot.lane.b32.xlu0 %v4375_v11, %s3525_s15 }
 0x3a4   : > { %v1145_v13 = vpop.permute.xlu0 %1144  ;;  %v1255_v16 = vpop.permute.xlu1 %1254 }
 0x3a5   : > { %v1151_v14 = vsel %vm1146_vm3, %v1145_v13, 0 }
 0x3a6   : > { %2473 = vmatpush3.bf16.xpose.msra.mxu1 %v1151_v14 }
 0x3a7   : > { %2484 = vmatprep.subr.bf16.mxu1 %v3517_v2 }
 0x3a8   : > { %v1257_v15 = vpop.permute.xlu0 %1256  ;;  %v1367_v18 = vpop.permute.xlu1 %1366 }
 0x3a9   : > { %v1262_v17 = vsel %vm1146_vm3, %v1257_v15, 0  ;;  %v1372_v19 = vsel %vm1146_vm3, %v1367_v18, 0 }
 0x3ac   : > { %v1477_v20 = vpop.permute.xlu1 %1476  ;;  %v1365_v21 = vpop.permute.xlu0 %1364 }
 0x3ad   : > { %2475 = vmatmul.mubr.msk.bf16.vlgmr.msra.gmra.mrb[0].mxu1 %vm1146_vm3, %v4375_v11  ;;  %v1482_v22 = vsel %vm1146_vm3, %v1477_v20, 0 }
 0x3ae   : > { %2485 = vmatpush3.bf16.xpose.msra.mxu1 %v1262_v17  ;;  %2486 = vmatprep.mubr.msk.bf16.mxu1 %vm3518_vm1, %v3517_v2 }
 0x3af   : > { %2496 = vmatprep.subr.bf16.mxu1 %v3517_v2 }
 0x3b0   : > { %v1475_v23 = vpop.permute.xlu0 %1474 }
 0x3b5   : > { %2487 = vmatmul.mubr.msk.bf16.vlgmr.msra.gmra.mrb[4].mxu1 %vm1146_vm3, %v1255_v16 }
 0x3b6   : > { %2497 = vmatpush3.bf16.xpose.msra.mxu1 %v1372_v19  ;;  %2498 = vmatprep.mubr.msk.bf16.mxu1 %vm3518_vm1, %v3517_v2 }
 0x3b7   : > { %2508 = vmatprep.subr.bf16.mxu1 %v3517_v2 }
 0x3bd   : > { %2499 = vmatmul.mubr.msk.bf16.vlgmr.msra.gmra.mrb[8].mxu1 %vm1146_vm3, %v1365_v21 }
 0x3be   : > { %2509 = vmatpush3.bf16.xpose.msra.mxu1 %v1482_v22  ;;  %2510 = vmatprep.mubr.msk.bf16.mxu1 %vm3518_vm1, %v3517_v2 }
 0x3bf   : > { %2520 = vmatprep.subr.bf16.mxu1 %v3517_v2 }
 0x3c5   : > { %2511 = vmatmul.mubr.msk.bf16.vlgmr.msra.gmra.mrb[12].mxu1 %vm1146_vm3, %v1475_v23 }
 0x3c6   : > { %2524 = vmatprep.mubr.msk.bf16.mxu1 %vm3518_vm1, %v3517_v2 }
 0x480   : > { %v1187_v25 = vpop.f32.mrb[0].mxu1 }
 0x481   : > { %v1188_v26 = vadd.f32 %v1187_v25, %v1074_v24  ;;  %v2476_v27 = vpop.f32.mrb[1].mxu1 }
 0x482   : > { %v1190_v28 = vpop.f32.mrb[2].mxu1 }
 0x483   : > { %v2477_v29 = vpop.f32.mrb[3].mxu1  ;;  %v1193_v30 = vsel %vm1146_vm3, %v1188_v26, -inf }
 0x484   : > { %1194 = vmax.xlane.f32.xlu1 %v1193_v30 }
 0x488   : > { %v1298_v31 = vpop.f32.mrb[4].mxu1 }
 0x489   : > { %v1299_v32 = vadd.f32 %v1298_v31, %v1074_v24  ;;  %v2488_v33 = vpop.f32.mrb[5].mxu1 }
 0x48a   : > { %v1301_v34 = vpop.f32.mrb[6].mxu1 }
 0x48b   : > { %v2489_v35 = vpop.f32.mrb[7].mxu1  ;;  %v1304_v36 = vsel %vm1146_vm3, %v1299_v32, -inf }
 0x48c   : > { %1305 = vmax.xlane.f32.xlu0 %v1304_v36 }
 0x490   : > { %v1408_v37 = vpop.f32.mrb[8].mxu1 }
 0x491   : > { %v1409_v38 = vadd.f32 %v1408_v37, %v1074_v24  ;;  %v2500_v39 = vpop.f32.mrb[9].mxu1 }
 0x492   : > { %v1411_v40 = vpop.f32.mrb[10].mxu1  ;;  %v2791_v39 = vld [vmem:[%s869_s7] sm:$0xff]  }
 0x493   : > { %v2501_v41 = vpop.f32.mrb[11].mxu1  ;;  %v1414_v42 = vsel %vm1146_vm3, %v1409_v38, -inf  ;;  %2521 = vmatpush3.bf16.msra.mxu1 %v2791_v39  ;;  %v2792_v40 = vld [vmem:[%s869_s7 + $0x8] sm:$0xff]  }
 0x494   : > { %1415 = vmax.xlane.f32.xlu0 %v1414_v42  ;;  %2522 = vmatprep.subr.bf16.mxu1 %v3517_v2 }
 0x497   : > { %2523 = vmatpush3.bf16.msra.mxu1 %v2792_v40 }
 0x498   : > { %v1518_v43 = vpop.f32.mrb[12].mxu1  ;;  %2536 = vmatprep.subr.bf16.mxu1 %v3517_v2 }
 0x499   : > { %v1519_v44 = vadd.f32 %v1518_v43, %v1074_v24  ;;  %v2512_v45 = vpop.f32.mrb[13].mxu1 }
 0x49a   : > { %v1521_v46 = vpop.f32.mrb[14].mxu1 }
 0x49b   : > { %v2513_v47 = vpop.f32.mrb[15].mxu1  ;;  %v1524_v48 = vsel %vm1146_vm3, %v1519_v44, -inf }
 0x49c   : > { %1525 = vmax.xlane.f32.xlu1 %v1524_v48 }
 0x511   : > { %v1195_v49 = vpop.xlane.xlu1 %1194 }
 0x512   : > { %v1196_v50 = vsub.f32 %v1188_v26, %v1195_v49 }
 0x514   : > { %v1197_v51 = vmul.f32 1.442695, %v1196_v50 }
 0x516   : > { %2799 = vpow2.f32 %v1197_v51 }
 0x519   : > { %v1306_v52 = vpop.xlane.xlu0 %1305 }
 0x51a   : > { %v1307_v53 = vsub.f32 %v1299_v32, %v1306_v52 }
 0x51c   : > { %v1308_v54 = vmul.f32 1.442695, %v1307_v53 }
 0x51e   : > { %2801 = vpow2.f32 %v1308_v54 }
 0x520   : > { %v2800_v55 = vpop.eup %2799 }
 0x521   : > { %v1416_v56 = vpop.xlane.xlu0 %1415  ;;  %v1199_v57 = vsel %vm1146_vm3, %v2800_v55, 0.0 }
 0x522   : > { %v1417_v58 = vsub.f32 %v1409_v38, %v1416_v56  ;;  %1200 = vadd.xlane.f32.xlu0 %v1199_v57  ;;  %v2398_v56 = vld [vmem:[%s877_s10] ss:$0 sm:$0xff] }
 0x524   : > { %v1418_v59 = vmul.f32 1.442695, %v1417_v58 }
 0x526   : > { %2803 = vpow2.f32 %v1418_v59 }
 0x528   : > { %v2802_v60 = vpop.eup %2801 }
 0x529   : > { %v1310_v61 = vsel %vm1146_vm3, %v2802_v60, 0.0  ;;  %v1526_v0 = vpop.xlane.xlu1 %1525 }
 0x52a   : > { %1311 = vadd.xlane.f32.xlu1 %v1310_v61  ;;  %v1527_v1 = vsub.f32 %v1519_v44, %v1526_v0 }
 0x52c   : > { %v1528_v3 = vmul.f32 1.442695, %v1527_v1 }
 0x52e   : > { %2805 = vpow2.f32 %v1528_v3 }
 0x530   : > { %v2804_v62 = vpop.eup %2803 }
 0x531   : > { %v1420_v63 = vsel %vm1146_vm3, %v2804_v62, 0.0 }
 0x532   : > { %1421 = vadd.xlane.f32.xlu0 %v1420_v63 }
 0x538   : > { %v2806_v5 = vpop.eup %2805 }
 0x539   : > { %v1530_v6 = vsel %vm1146_vm3, %v2806_v5, 0.0 }
 0x53b   : > { %1316 = vrot.lane.b32.xlu1 %v4375_v11, %s3526_s8 }
 0x548   : > { %1205 = vrot.lane.b32.xlu0 %v4375_v11, %s3527_s11 }
 0x54c   : > { %1536 = vrot.lane.b32.xlu0 %v4375_v11, %s3528_s22 }
 0x55f   : > { %1531 = vadd.xlane.f32.xlu1 %v1530_v6 }
 0x570   : > { %1426 = vrot.lane.b32.xlu1 %v4375_v11, %s3529_s30 }
 0x5af   : > { %v1201_v7 = vpop.xlane.xlu0 %1200 }
 0x5b0   : > { %2807 = vrcp.f32 %v1201_v7  ;;  %v2793_v7 = vld [vmem:[%s918_s13] sm:$0xff]  }
 0x5b7   : > { %v1312_v8 = vpop.xlane.xlu1 %1311 }
 0x5b8   : > { %2809 = vrcp.f32 %v1312_v8  ;;  %v2795_v8 = vld [vmem:[%s4335_s17] sm:$0xff]  }
 0x5ba   : > { %v2808_v9 = vpop.eup %2807 }
 0x5bb   : > { %v1203_v12 = vmul.f32 %v2808_v9, %v2800_v55  ;;  %v1317_v15 = vpop.permute.xlu1 %1316  ;;  %v2796_v9 = vld [vmem:[%s4335_s17 + $0x8] sm:$0xff]  }
 0x5bc   : > { %v1322_v18 = vsel %vm1210_vm4, %v1317_v15, 0  ;;  %v2402_v15 = vld [vmem:[%s885_s27] ss:$0 sm:$0xff] }
 0x5bd   : > { %v1204_v16 = vpack.c.bf16 %v1203_v12, %v1203_v12 }
 0x5bf   : > { %v1422_v10 = vpop.xlane.xlu0 %1421 }
 0x5c0   : > { %2811 = vrcp.f32 %v1422_v10 }
 0x5c2   : > { %v2810_v17 = vpop.eup %2809 }
 0x5c3   : > { %v1206_v13 = vpop.permute.xlu0 %1205  ;;  %v1314_v11 = vmul.f32 %v2810_v17, %v2802_v60  ;;  %v2403_v17 = vld [vmem:[%s893_s3] ss:$0 sm:$0xff] }
 0x5c4   : > { %v1212_v14 = vsel %vm1210_vm4, %v1206_v13, 0 }
 0x5c5   : > { %2479 = vmatpush3.bf16.msra.mxu0 %v1212_v14  ;;  %v1315_v19 = vpack.c.bf16 %v1314_v11, %v1314_v11 }
 0x5c6   : > { %2490 = vmatprep.subr.bf16.mxu0 %v3517_v2 }
 0x5c7   : > { %v1537_v25 = vpop.permute.xlu0 %1536 }
 0x5c8   : > { %2481 = vmatmul.mubr.msk.bf16.vlgmr.msra.gmra.mrb[4].mxu0 %vm1146_vm3, %v1204_v16  ;;  %v1542_v27 = vsel %vm1210_vm4, %v1537_v25, 0 }
 0x5c9   : > { %2491 = vmatpush3.bf16.msra.mxu0 %v1322_v18  ;;  %2492 = vmatprep.mubr.msk.bf16.mxu0 %vm3518_vm1, %v3517_v2 }
 0x5ca   : > { %2502 = vmatprep.subr.bf16.mxu0 %v3517_v2  ;;  %v2812_v20 = vpop.eup %2811 }
 0x5cb   : > { %v1424_v22 = vmul.f32 %v2812_v20, %v2804_v62  ;;  %v2797_v20 = vld [vmem:[%s4335_s17 + $0x10] sm:$0xff]  }
 0x5cd   : > { %v1425_v26 = vpack.c.bf16 %v1424_v22, %v1424_v22  ;;  %v2404_v22 = vld [vmem:[%s926_s0] ss:$0 sm:$0xff] }
 0x5d0   : > { %2493 = vmatmul.mubr.msk.bf16.vlgmr.msra.gmra.mrb[8].mxu0 %vm1146_vm3, %v1315_v19 }
 0x5d1   : > { %2504 = vmatprep.mubr.msk.bf16.mxu0 %vm3518_vm1, %v3517_v2 }
 0x5ec   : > { %v1532_v21 = vpop.xlane.xlu1 %1531 }
 0x5ed   : > { %2813 = vrcp.f32 %v1532_v21  ;;  %v2798_v21 = vld [vmem:[%s4335_s17 + $0x18] sm:$0xff]  }
 0x5f0   : > { %v1427_v23 = vpop.permute.xlu1 %1426 }
 0x5f1   : > { %v1432_v24 = vsel %vm1210_vm4, %v1427_v23, 0 }
 0x5f2   : > { %2503 = vmatpush3.bf16.msra.mxu0 %v1432_v24 }
 0x5f3   : > { %2514 = vmatprep.subr.bf16.mxu0 %v3517_v2 }
 0x5f5   : > { %2505 = vmatmul.mubr.msk.bf16.vlgmr.msra.gmra.mrb[12].mxu0 %vm1146_vm3, %v1425_v26 }
 0x5f6   : > { %2515 = vmatpush3.bf16.msra.mxu0 %v1542_v27  ;;  %2516 = vmatprep.mubr.msk.bf16.mxu0 %vm3518_vm1, %v3517_v2 }
 0x5f7   : > { %v2814_v28 = vpop.eup %2813  ;;  %2528 = vmatprep.subr.bf16.mxu0 %v3517_v2 }
 0x5f8   : > { %v1534_v29 = vmul.f32 %v2814_v28, %v2806_v5 }
 0x5fa   : > { %v1535_v30 = vpack.c.bf16 %v1534_v29, %v1534_v29 }
 0x5fd   : > { %2517 = vmatmul.mubr.msk.bf16.vlgmr.msra.gmra.mrb[16].mxu0 %vm1146_vm3, %v1535_v30  ;;  %v2408_v30 = vld [vmem:[%s943_s28] ss:$0 sm:$0xff] }
 0x5fe   : > { %2532 = vmatprep.mubr.msk.bf16.mxu0 %vm3518_vm1, %v3517_v2  ;;  %2529 = vmatpush3.bf16.msra.mxu0 %v2793_v7 }
 0x5ff   : > { %2530 = vmatprep.subr.bf16.mxu0 %v3517_v2 }
 0x69b   : > { %v1248_v31 = vpop.f32.mrb[4].mxu0 }
 0x69c   : > { %v2482_v32 = vpop.f32.mrb[5].mxu0 }
 0x69d   : > { %v1251_v33 = vpop.f32.mrb[6].mxu0 }
 0x69e   : > { %v2483_v34 = vpop.f32.mrb[7].mxu0 }
 0x6a3   : > { %v1358_v35 = vpop.f32.mrb[8].mxu0 }
 0x6a4   : > { %1585 = vrot.lane.b32.xlu1 %v1358_v35, %s3530_s4  ;;  %v2494_v36 = vpop.f32.mrb[9].mxu0 }
 0x6a5   : > { %v1361_v37 = vpop.f32.mrb[10].mxu0 }
 0x6a6   : > { %v2495_v38 = vpop.f32.mrb[11].mxu0 }
 0x6c8   : > { %v1468_v41 = vpop.f32.mrb[12].mxu0 }
 0x6c9   : > { %1589 = vrot.lane.b32.xlu0 %v1468_v41, %s3531_s20  ;;  %v2506_v42 = vpop.f32.mrb[13].mxu0 }
 0x6ca   : > { %v1471_v43 = vpop.f32.mrb[14].mxu0 }
 0x6cb   : > { %v2507_v44 = vpop.f32.mrb[15].mxu0 }
 0x6d0   : > { %v1578_v45 = vpop.f32.mrb[16].mxu0 }
 0x6d1   : > { %1593 = vrot.lane.b32.xlu1 %v1578_v45, %s3532_s5  ;;  %v2518_v46 = vpop.f32.mrb[17].mxu0 }
 0x6d2   : > { %v1581_v47 = vpop.f32.mrb[18].mxu0  ;;  %v2414_v46 = vld [vmem:[%s901_s16] ss:$0 sm:$0xff] }
 0x6d3   : > { %v2519_v48 = vpop.f32.mrb[19].mxu0 }
 0x6d4   : > { %v2415_v48 = vld [vmem:[%s909_s21] ss:$0 sm:$0xff] }
 0x716   : > { %v1586_v49 = vpop.permute.xlu1 %1585 }
 0x717   : > { %v1596_v51 = vsel %vm1146_vm3, %v1248_v31, %v1586_v49 }
 0x73b   : > { %v1590_v50 = vpop.permute.xlu0 %1589 }
 0x73c   : > { %v1598_v52 = vsel %vm1597_vm5, %v1596_v51, %v1590_v50 }
 0x743   : > { %v1594_v53 = vpop.permute.xlu1 %1593 }
 0x744   : > { %v1600_v54 = vsel %vm1599_vm6, %v1598_v52, %v1594_v53 }
 0x745   : > { %v1601_v55 = vpack.c.bf16 %v1600_v54, %v1600_v54 }
 0x747   : > { %2525 = vmatmul.mubr.msk.bf16.vlgmr.msra.gmra.mrb[16].mxu1 %vm1098_vm2, %v1601_v55 }
 0x748   : > { %2544 = vmatprep.mubr.msk.bf16.mxu1 %vm3518_vm1, %v3517_v2  ;;  %2537 = vmatpush3.bf16.msra.mxu1 %v2795_v8 }
 0x749   : > { %2538 = vmatprep.subr.bf16.mxu1 %v3517_v2 }
 0x74c   : > { %2539 = vmatpush3.bf16.msra.mxu1 %v2796_v9 }
 0x74d   : > { %2540 = vmatprep.subr.bf16.mxu1 %v3517_v2 }
 0x750   : > { %2541 = vmatpush3.bf16.msra.mxu1 %v2797_v20 }
 0x751   : > { %2542 = vmatprep.subr.bf16.mxu1 %v3517_v2 }
 0x754   : > { %2543 = vmatpush3.bf16.msra.mxu1 %v2798_v21 }
 0x81a   : > { %v1662_v57 = vpop.f32.mrb[16].mxu1 }
 0x81b   : > { %v1663_v58 = vadd.f32 %v2398_v56, %v1662_v57  ;;  %v2526_v59 = vpop.f32.mrb[17].mxu1  ;;  %v2819_v57 = vld [vmem:[#allocation23] sm:$0xff] (!%p2416_p10)  }
 0x81c   : > { %v1665_v60 = vpop.f32.mrb[18].mxu1  ;;  %v2820_v59 = vld [vmem:[#allocation23 + $0x8] sm:$0xff] (!%p2416_p10)  }
 0x81d   : > { %v2527_v61 = vpop.f32.mrb[19].mxu1  ;;  %v1668_v62 = vadd.f32 %v1663_v58, %v4362_v4  ;;  %v2794_v4 = vld [vmem:[%s918_s13 + $0x8] sm:$0xff]   ;;  %v3533_v58 = vmov (!%p2416_p10), 0.0  }
 0x81e   : > { %2531 = vmatpush3.bf16.msra.mxu0 %v2794_v4  ;;  %v2419_v4 = vld [vmem:[#allocation24] ss:$0 sm:$0xff] (!%p2416_p10) }
 0x81f   : > { %v1671_v63 = vsel %vm1098_vm2, %v1668_v62, 0.0  ;;  %2548 = vmatprep.subr.bf16.mxu0 (!%p2416_p10), %v3533_v58 }
 0x820   : > { %1672 = vadd.xlane.f32.xlu0 %v1671_v63 }
 0x8ad   : > { %v1673_v0 = vpop.xlane.xlu0 %1672 }
 0x8ae   : > { %v1675_v1 = vmul.f32 0.03125, %v1673_v0  ;;  %v2417_v0 = vld [vmem:[#allocation20] ss:$0 sm:$0xff] (!%p2416_p10) }
 0x8b0   : > { %v1676_v3 = vsub.f32 %v1668_v62, %v1675_v1 }
 0x8b2   : > { %v1677_v5 = vmul.f32 %v1676_v3, %v1676_v3 }
 0x8b4   : > { %v1678_v6 = vsel %vm1098_vm2, %v1677_v5, 0.0 }
 0x8b5   : > { %1679 = vadd.xlane.f32.xlu1 %v1678_v6 }
 0x942   : > { %v1680_v10 = vpop.xlane.xlu1 %1679 }
 0x943   : > { %v1681_v12 = vmul.f32 0.03125, %v1680_v10 }
 0x945   : > { %v1682_v13 = vadd.f32 1e-05, %v1681_v12 }
 0x947   : > { %2815 = vrsqrt.f32 %v1682_v13 }
 0x951   : > { %v2816_v14 = vpop.eup %2815 }
 0x952   : > { %v1684_v16 = vmul.f32 %v2816_v14, %v1676_v3  ;;  %v2418_v3 = vld [vmem:[#allocation21] ss:$0 sm:$0xff] (!%p2416_p10) }
 0x954   : > { %v1691_v18 = vmul.f32 %v2402_v15, %v1684_v16 }
 0x956   : > { %v1698_v11 = vadd.f32 %v2403_v17, %v1691_v18 }
 0x958   : > { %v1699_v19 = vpack.c.bf16 %v1698_v11, %v1698_v11 }
 0x95a   : > { %2533 = vmatmul.mubr.msk.bf16.vlgmr.msra.gmra.mrb[20].mxu0 %vm1098_vm2, %v1699_v19 }
 0x95b   : > { %2552 = vmatprep.mubr.msk.bf16.mxu0 (!%p2416_p10), %vm3534_vm8, %v3533_v58  ;;  %2549 = vmatpush3.bf16.msra.mxu0 (!%p2416_p10), %v2819_v57 }
 0x95c   : > { %2550 = vmatprep.subr.bf16.mxu0 (!%p2416_p10), %v3533_v58 }
 0x95f   : > { %2551 = vmatpush3.bf16.msra.mxu0 (!%p2416_p10), %v2820_v59 }
 0xa2d   : > { %v1760_v23 = vpop.f32.mrb[20].mxu0 }
 0xa2e   : > { %v1761_v24 = vadd.f32 %v2404_v22, %v1760_v23  ;;  %v2534_v25 = vpop.f32.mrb[21].mxu0 }
 0xa2f   : > { %v1763_v26 = vpop.f32.mrb[22].mxu0 }
 0xa30   : > { %v1766_v27 = vmax.f32 %v1761_v24, 0.0  ;;  %v2535_v28 = vpop.f32.mrb[23].mxu0 }
 0xa32   : > { %v1767_v29 = vpack.c.bf16 %v1766_v27, %v1766_v27 }
 0xa34   : > { %2545 = vmatmul.mubr.msk.bf16.vlgmr.msra.gmra.mrb[20].mxu1 %vm1807_vm7, %v1767_v29 }
 0xb07   : > { %v1845_v31 = vpop.f32.mrb[20].mxu1 }
 0xb08   : > { %v1846_v32 = vadd.f32 %v2408_v30, %v1845_v31  ;;  %v2546_v33 = vpop.f32.mrb[21].mxu1 }
 0xb09   : > { %v1848_v34 = vpop.f32.mrb[22].mxu1 }
 0xb0a   : > { %v2547_v2 = vpop.f32.mrb[23].mxu1  ;;  %v1851_v35 = vadd.f32 %v1846_v32, %v1698_v11 }
 0xb0c   : > { %v1854_v36 = vsel %vm1098_vm2, %v1851_v35, 0.0 }
 0xb0d   : > { %1855 = vadd.xlane.f32.xlu0 %v1854_v36 }
 0xb9a   : > { %v1856_v37 = vpop.xlane.xlu0 %1855 }
 0xb9b   : > { %v1857_v38 = vmul.f32 0.03125, %v1856_v37 }
 0xb9d   : > { %v1858_v39 = vsub.f32 %v1851_v35, %v1857_v38 }
 0xb9f   : > { %v1859_v40 = vmul.f32 %v1858_v39, %v1858_v39 }
 0xba1   : > { %v1860_v41 = vsel %vm1098_vm2, %v1859_v40, 0.0 }
 0xba2   : > { %1861 = vadd.xlane.f32.xlu0 %v1860_v41 }
 0xc2f   : > { %v1862_v42 = vpop.xlane.xlu0 %1861 }
 0xc30   : > { %v1863_v43 = vmul.f32 0.03125, %v1862_v42 }
 0xc32   : > { %v1864_v44 = vadd.f32 1e-05, %v1863_v43 }
 0xc34   : > { %2817 = vrsqrt.f32 %v1864_v44 }
 0xc3e   : > { %v2818_v45 = vpop.eup %2817 }
 0xc3f   : > { %v1866_v47 = vmul.f32 %v2818_v45, %v1858_v39  ;;  %1885 = sbr.rel (%p2416_p10) target bundleno = 3671 (0xe57), region = 172 }
 0xc41   : > { %v1873_v49 = vmul.f32 %v2414_v46, %v1866_v47 }
 0xc43   : > { %v1880_v50 = vadd.f32 %v2415_v48, %v1873_v49 }
 0xc45   : > { %1881 = vst.msk [vmem:[#allocation2] sm:$0xff] %vm1098_vm2, %v1880_v50  ;;  %v1888_v51 = vsel (!%p2416_p10), %vm1098_vm2, %v1880_v50, 0.0 }
 0xc46   : > { %1889 = vadd.xlane.f32.xlu0 %v1888_v51 }
 0xcd3   : > { %v1890_v52 = vpop.xlane.xlu0 %1889 }
 0xcd4   : > { %v1891_v53 = vmul.f32 0.03125, %v1890_v52 }
 0xcd6   : > { %v1892_v54 = vsub.f32 %v1880_v50, %v1891_v53 }
 0xcd8   : > { %v1893_v55 = vmul.f32 %v1892_v54, %v1892_v54 }
 0xcda   : > { %v1894_v56 = vsel %vm1098_vm2, %v1893_v55, 0.0 }
 0xcdb   : > { %1895 = vadd.xlane.f32.xlu0 %v1894_v56 }
 0xd68   : > { %v1896_v60 = vpop.xlane.xlu0 %1895 }
 0xd69   : > { %v1897_v61 = vmul.f32 0.03125, %v1896_v60 }
 0xd6b   : > { %v1898_v62 = vadd.f32 1e-05, %v1897_v61 }
 0xd6d   : > { %2821 = vrsqrt.f32 %v1898_v62 }
 0xd77   : > { %v2822_v63 = vpop.eup %2821 }
 0xd78   : > { %v1900_v1 = vmul.f32 %v2822_v63, %v1892_v54 }
 0xd7a   : > { %v1907_v5 = vmul.f32 %v2417_v0, %v1900_v1 }
 0xd7c   : > { %v1914_v6 = vadd.f32 %v2418_v3, %v1907_v5 }
 0xd7e   : > { %v1915_v7 = vpack.c.bf16 %v1914_v6, %v1914_v6 }
 0xd80   : > { %2553 = vmatmul.mubr.msk.bf16.vlgmr.msra.gmra.mrb[0].mxu0 %vm1098_vm2, %v1915_v7 }
 0xe53   : > { %v1976_v8 = vpop.f32.mrb[0].mxu0 }
 0xe54   : > { %v1977_v9 = vadd.f32 %v2419_v4, %v1976_v8  ;;  %v2554_v10 = vpop.f32.mrb[1].mxu0 }
 0xe55   : > { %v1979_v12 = vpop.f32.mrb[2].mxu0 }
 0xe56   : > { %1982 = vst [vmem:[%s1063_s19] sm:$0xff] %v1977_v9  ;;  %v2555_v13 = vpop.f32.mrb[3].mxu0 }
 0xe57 PF: > { %s4728_s29 = sld [smem:[#allocation40_spill]]  ;;  %s4730_s10 = sld [smem:[#allocation50_spill]] }
 0xe58   : > { %s4731_s21 = sld [smem:[#allocation70_spill]]  ;;  %s1997_s17 = sshll.u32 %s1063_s19, 4  ;;  %s1998_s17 = int_to_ptr.vmem [resolvable:$true] %s1997_s17 }
 0xe59   : > { %s1984_s28 = scalar_lea.sflag [#allocation5], %s837_s12  ;;  %s3353_s14 = scalar_lea.vmem %s1998_s17, 128 }
 0xe5a   : > { %p3354_p13 = scmp.ne.s32.totalorder %s1998_s17, %s3353_s14  ;;  %s3535_s25 = smov [#allocation26]  }
 0xe5b   : > { %s3357_s15 = sshll.u32 %s3535_s25, 4  ;;  %s3358_s15 = int_to_ptr.vmem [resolvable:$false] %s3357_s15 }
 0xe5c   : > { %s3359_s8 = scalar_lea.vmem %s3358_s15, 256  ;;  %p3360_p6 = scmp.lt.s32.totalorder %s1998_s17, %s3358_s15 }
 0xe5d   : > { %s2424_s27 = sshll.u32 %s4728_s29, 7  ;;  %p4733_p7 = scmp.ne.s32.totalorder %s4730_s10, 0 }
 0xe5e   : > { %s4732_s13 = smov %s4731_s21  ;;  %s4490_s0 = scalar_lea.hbm %s4731_s21, %s2424_s27 }
 0xe5f   : > { %p3355_p8 = pnand %p3354_p13, %p4733_p7  ;;  %p3361_p2 = scmp.lt.s32.totalorder %s3359_s8, %s3353_s14 }
 0xe61   : > { %p3356_p0 = pneg %p3355_p8  ;;  %p3362_p4 = por %p3361_p2, %p3360_p6 }
 0xe63   : > { %p3363_p12 = pnand %p3362_p4, %p3356_p0 }
 0xe65   : > { %3366 = shalt.err (!%p3363_p12)
}
 0xe66   : > { %s3367_s12 = scalar_lea.hbm %s4490_s0, 128  ;;  %s3371_s11 = scalar_lea.hbm %s4732_s13, 256 }
 0xe67   : > { %p3368_p5 = scmp.ne.s32.totalorder %s4490_s0, %s3367_s12  ;;  %p3372_p3 = scmp.lt.u32.totalorder %s4490_s0, %s4732_s13 }
 0xe68   : > { %p3373_p1 = scmp.lt.u32.totalorder %s3371_s11, %s3367_s12  ;;  %p3375_p13 = scmp.lt.u32.totalorder %s3367_s12, %s4490_s0 }
 0xe69   : > { %p3369_p11 = pnand %p3368_p5, %p4733_p7 }
 0xe6a   : > { %p3374_p10 = por %p3373_p1, %p3372_p3 }
 0xe6b   : > { %p3370_p9 = pneg %p3369_p11 }
 0xe6c   : > { %p3376_p8 = por %p3375_p13, %p3374_p10 }
 0xe6e   : > { %p3377_p0 = pnand %p3376_p8, %p3370_p9 }
 0xe70   : > { %3380 = shalt.err (!%p3377_p0)
}
 0xe71   : > { %2602 = dma.vmem_to_hbm [thread:$0]  (%p4733_p7), %s1998_s17, 128, %s4490_s0, %s1984_s28  }
 0xe72 PF: > { %s4734_s4 = sld [smem:[#allocation36_spill]]  ;;  %s4735_s20 = sld [smem:[#allocation51_spill]] }
 0xe73   : > { %p2675_p6 = scmp.ge.s32.totalorder %s3495_s2, 2 }
 0xe78   : > { %s2009_s5 = sand.u32 1, %s4734_s4   ;;  %p4736_p2 = scmp.ne.s32.totalorder %s4735_s20, 0 }
 0xe79   : > { %s2010_s1 = scalar_lea.sflag [#allocation5], %s2009_s5 }
 0xe7a   : > { %p2661_p4 = pnand %p2675_p6, %p4736_p2 }
 0xe7c   : > { %3450 = dma.done.wait (!%p2661_p4), %s2010_s1, 128  }
 0xe7d   : > { %3452 = vsyncadd (!%p2661_p4), %s2010_s1, 4294967168  ;;  %s37_s2 = sadd.s32 1, %s3495_s2   ;;  %s4737_s27 = sld [smem:[#allocation34_spill]] }
 0xe7e   : > { %p34_p12 = scmp.ge.s32.totalorder %s37_s2, 6   ;;  %s4738_s28 = sld [smem:[#allocation35_spill]] }
 0xe7f   : > { %s4739_s29 = sld [smem:[#allocation47_spill]]  ;;  %s4740_s30 = sld [smem:[#allocation37_spill]] }
 0xe80   : > { %s4741_s0 = sld [smem:[#allocation38_spill]]  ;;  %s4742_s19 = sld [smem:[#allocation48_spill]] }
 0xe81   : > { %s4743_s1 = sld [smem:[#allocation41_spill]]  ;;  %s4744_s20 = sld [smem:[#allocation42_spill]] }
 0xe82   : > { %s4745_s21 = sld [smem:[#allocation44_spill]]  ;;  %s4746_s22 = sld [smem:[#allocation45_spill]] }
 0xe83   :  { %36 = sbr.rel (!%p34_p12) target bundleno = 32 (0x20), region = 297 }
 0xe8a   :  { %2015 = vsyncpa [#allocation4], 1 }
 0xe8b   :  { %2017 = vsyncpa [#allocation4 + $0x1], 1 }
 0xe8c   :  { %2018 = vsyncpa [#allocation7], 1 }
 0xe8d   :  { %2019 = vsyncpa [#allocation22], 1 }
 0xe8e   :  { %2020 = vsyncpa [#allocation25], 1 }
 0xe8f   :  { %2021 = vsyncpa [#allocation5], 1 }
 0xe90   :  { %2023 = vsyncpa [#allocation5 + $0x1], 1 }

</bundles_post_ra>
